<compile_context>
chip_gen: v7x
topology: tpu7x:2x2x1
jax: 0.10.0
libtpu: 0.0.40
codegen_flags: <defaults>
</compile_context>

<pallas_src>
import jax
import jax.numpy as jnp
import numpy as np
from jax.experimental import pallas as pl
from jax.experimental.pallas import tpu as pltpu

LANE = 128  # TPU lane width


def _round_up(x, m):
    return ((x + m - 1) // m) * m


# ------------------------------ fused kernel ------------------------------- #

def _make_fused_kernel(edge_dim, num_layers, bs, num_node, out_dim):
    """Build the fused (all layers + readout + MLP + log_softmax) kernel body."""
    A = edge_dim  # static

    def kernel(x_ref, src_ref, dst_ref, ea_ref, wbig_ref, wroot_ref, bias_ref,
               w1_ref, b1_ref, w2_ref, b2_ref, o_ref, h_ref, acc_ref):
        l = pl.program_id(0)          # layer index   (arbitrary / carried)
        t = pl.program_id(1)          # edge tile idx (arbitrary / reduction)
        n_tiles = pl.num_programs(1)
        n = h_ref.shape[0]
        te = src_ref.shape[0]

        # Very first step: load the lane-padded input features into the
        # persistent hidden-state scratch (h never round-trips HBM after this).
        @pl.when((l == 0) & (t == 0))
        def _load_input():
            h_ref[...] = x_ref[...]

        # First edge tile of each layer: init accumulator with root transform
        # + bias.  bf16 MXU operands, f32 accumulate.
        @pl.when(t == 0)
        def _init_acc():
            acc_ref[...] = (
                jnp.dot(h_ref[...].astype(jnp.bfloat16), wroot_ref[...],
                        preferred_element_type=jnp.float32)
                + bias_ref[...])

        # ---- edge-tile update: gather -> edge-conditioned message -> scatter ----
        h_bf16 = h_ref[...].astype(jnp.bfloat16)                   # [N, Dp]
        src = src_ref[...]                                          # [TE, 1] int32 (-1 pad)
        dst = dst_ref[...]                                          # [1, TE] int32 (-1 pad)
        ea = ea_ref[...]                                            # [TE, Ap] f32 (lane-padded)

        # gather source-node features: in-kernel 0/1 mask -> bf16 MXU matmul
        col = jax.lax.broadcasted_iota(jnp.int32, (te, n), 1)
        gmask = jnp.where(col == src, 1.0, 0.0).astype(jnp.bfloat16)   # [TE, N]
        x_src = jnp.dot(gmask, h_bf16, preferred_element_type=jnp.float32)  # [TE, Dp]

        # edge-conditioned message as ONE deep-K matmul:
        #   msg = [x_src | x_src*ea_0 | ... | x_src*ea_{A-1}] @ [B; Theta_0; ...; Theta_{A-1}]
        parts = [x_src] + [x_src * ea[:, a:a + 1] for a in range(A)]
        x_big = jnp.concatenate(parts, axis=1).astype(jnp.bfloat16)    # [TE, (A+1)*Dp]
        msg = jnp.dot(x_big, wbig_ref[...],
                      preferred_element_type=jnp.float32)              # [TE, Hp]

        # scatter-add onto destination nodes: in-kernel 0/1 mask -> bf16 MXU matmul
        row = jax.lax.broadcasted_iota(jnp.int32, (n, te), 0)
        smask = jnp.where(row == dst, 1.0, 0.0).astype(jnp.bfloat16)   # [N, TE]
        acc_ref[...] += jnp.dot(smask, msg.astype(jnp.bfloat16),
                                preferred_element_type=jnp.float32)    # [N, Hp]

        # ---- layer finalize ----
        @pl.when(t == n_tiles - 1)
        def _finalize_layer():
            h_new = jnp.maximum(acc_ref[...], 0.0)   # ReLU (dropout: inference no-op)

            @pl.when(l < num_layers - 1)
            def _carry():
                h_ref[...] = h_new                   # feeds the next layer, stays in VMEM

            @pl.when(l == num_layers - 1)
            def _readout_mlp():
                hp = h_new.shape[1]
                # cat_max_sum readout (position-grouped, matches reference reshape)
                xr = h_new.reshape(bs, num_node, hp)
                g_max = jnp.max(xr, axis=1)                           # [bs, Hp]
                g_sum = jnp.sum(xr, axis=1)                           # [bs, Hp]
                gcat = jnp.concatenate([g_max, g_sum], axis=-1)       # [bs, 2*Hp]

                # 2-layer MLP (one-off epilogue, kept f32)
                h1 = jnp.maximum(
                    jnp.dot(gcat, w1_ref[...], preferred_element_type=jnp.float32)
                    + b1_ref[...], 0.0)
                logits = (jnp.dot(h1, w2_ref[...], preferred_element_type=jnp.float32)
                          + b2_ref[...])                              # [bs, OUTp]

                # masked log_softmax over the first out_dim (valid) lanes
                colo = jax.lax.broadcasted_iota(jnp.int32, logits.shape, 1)
                valid = colo < out_dim
                masked = jnp.where(valid, logits, jnp.full_like(logits, -1e30))
                m = jnp.max(masked, axis=-1, keepdims=True)
                e_ = jnp.where(valid, jnp.exp(masked - m), jnp.zeros_like(masked))
                lse = jnp.log(jnp.sum(e_, axis=-1, keepdims=True)) + m
                o_ref[...] = masked - lse                             # lane-dense store

    return kernel


# ------------------------------ model wrapper ------------------------------ #

def init_params(key, input_dim, hidden_dim, output_dim, edge_dim, num_layers):
    def uni(k, shape):
        fan_in, fan_out = shape[0], shape[-1]
        lim = (6.0 / (fan_in + fan_out)) ** 0.5
        return jax.random.uniform(k, shape, jnp.float32, -lim, lim)

    params = {"convs": []}
    cur = input_dim
    for _ in range(num_layers):
        key, k1, k2, k3 = jax.random.split(key, 4)
        params["convs"].append({
            "theta_w": uni(k1, (edge_dim, cur * hidden_dim)),   # edge network
            "theta_b": jnp.zeros((cur * hidden_dim,), jnp.float32),
            "w_root": uni(k2, (cur, hidden_dim)),
            "bias": jnp.zeros((1, hidden_dim), jnp.float32),
        })
        cur = hidden_dim
    mlp_dim = cur * 2  # readout == 'cat_max_sum'
    key, k1, k2 = jax.random.split(key, 3)
    params["w1"] = uni(k1, (mlp_dim, mlp_dim))
    params["b1"] = jnp.zeros((1, mlp_dim), jnp.float32)
    params["w2"] = uni(k2, (mlp_dim, output_dim))
    params["b2"] = jnp.zeros((1, output_dim), jnp.float32)
    return params


def gnn_basic_forward(x, edge_index, edge_attr, batch, params, *,
                      hidden_dim, output_dim, bs):
    """Equivalent of GNN_basic.forward (graph_regression=False, 'cat_max_sum').

    `bs` is a static Python int; cat_max_sum groups nodes positionally into
    contiguous blocks of n // bs nodes (exactly what the reference reshape does).
    """
    del batch  # readout groups nodes positionally, matching the reference reshape
    n, din = x.shape
    assert n % bs == 0, "cat_max_sum needs equal-sized, contiguous graphs"
    num_node = n // bs
    e, a_dim = edge_attr.shape
    num_layers = len(params["convs"])

    src = edge_index[0].astype(jnp.int32)
    dst = edge_index[1].astype(jnp.int32)
    edge_weight = jnp.ones((e,), jnp.float32)          # _argsparse default
    ea = edge_attr * edge_weight[:, None]

    # shared lane-padded feature width (input and hidden both fit)
    feat = _round_up(max(din, hidden_dim), LANE)
    hp = feat

    # --- edge-axis padding; dummy edges carry index -1 (match no node) ---
    edge_tile = min(512, _round_up(e, LANE))
    e_pad = _round_up(e, edge_tile)
    src_p = jnp.full((e_pad, 1), -1, jnp.int32).at[:e, 0].set(src)
    dst_p = jnp.full((1, e_pad), -1, jnp.int32).at[0, :e].set(dst)
    a_pad = _round_up(a_dim, LANE)
    ea_p = jnp.zeros((e_pad, a_pad), jnp.float32).at[:e, :a_dim].set(ea)

    # --- lane-pad node features ---
    x_p = jnp.zeros((n, feat), jnp.float32).at[:, :din].set(x)

    # --- stacked, lane-padded, bf16 conv weights (per layer) ---
    wbig_all, wroot_all, bias_all = [], [], []
    cur = din
    for lp in params["convs"]:
        theta = lp["theta_w"].reshape(a_dim, cur, hidden_dim)
        bmat = lp["theta_b"].reshape(cur, hidden_dim)
        wbig = jnp.zeros((a_dim + 1, feat, hp), jnp.float32)
        wbig = wbig.at[0, :cur, :hidden_dim].set(bmat)            # bias block of edge net
        wbig = wbig.at[1:, :cur, :hidden_dim].set(theta)          # Theta_a blocks
        wbig_all.append(wbig.reshape((a_dim + 1) * feat, hp))
        wroot = jnp.zeros((feat, hp), jnp.float32).at[:cur, :hidden_dim].set(lp["w_root"])
        wroot_all.append(wroot)
        bias_all.append(jnp.zeros((1, hp), jnp.float32).at[:, :hidden_dim].set(lp["bias"]))
        cur = hidden_dim
    wbig_all = jnp.stack(wbig_all).astype(jnp.bfloat16)     # [L, (A+1)*Dp, Hp]
    wroot_all = jnp.stack(wroot_all).astype(jnp.bfloat16)   # [L, Dp, Hp]
    bias_all = jnp.stack(bias_all)                           # [L, 1, Hp] f32

    # --- lane-padded MLP params (f32, one-off epilogue) ---
    mlp_dim = 2 * hidden_dim
    midp = _round_up(mlp_dim, LANE)
    outp = _round_up(output_dim, LANE)
    w1p = jnp.zeros((2 * hp, midp), jnp.float32)
    w1p = w1p.at[:hidden_dim, :mlp_dim].set(params["w1"][:hidden_dim])
    w1p = w1p.at[hp:hp + hidden_dim, :mlp_dim].set(params["w1"][hidden_dim:])
    b1p = jnp.zeros((1, midp), jnp.float32).at[:, :mlp_dim].set(params["b1"])
    w2p = jnp.zeros((midp, outp), jnp.float32).at[:mlp_dim, :output_dim].set(params["w2"])
    b2p = jnp.zeros((1, outp), jnp.float32).at[:, :output_dim].set(params["b2"])

    kernel = _make_fused_kernel(a_dim, num_layers, bs, num_node, output_dim)

    in_specs = [
        pl.BlockSpec((n, feat), lambda l, t: (0, 0)),                  # x (lane-padded)
        pl.BlockSpec((edge_tile, 1), lambda l, t: (t, 0)),             # src indices (int32)
        pl.BlockSpec((1, edge_tile), lambda l, t: (0, t)),             # dst indices (int32)
        pl.BlockSpec((edge_tile, a_pad), lambda l, t: (t, 0)),         # edge attrs (padded)
        pl.BlockSpec((None, (a_dim + 1) * feat, hp), lambda l, t: (l, 0, 0)),  # [B;Theta] bf16
        pl.BlockSpec((None, feat, hp), lambda l, t: (l, 0, 0)),        # root weight bf16
        pl.BlockSpec((None, 1, hp), lambda l, t: (l, 0, 0)),           # conv bias f32
        pl.BlockSpec((2 * hp, midp), lambda l, t: (0, 0)),             # w1
        pl.BlockSpec((1, midp), lambda l, t: (0, 0)),                  # b1
        pl.BlockSpec((midp, outp), lambda l, t: (0, 0)),               # w2
        pl.BlockSpec((1, outp), lambda l, t: (0, 0)),                  # b2
    ]

    out_p = pl.pallas_call(
        kernel,
        out_shape=jax.ShapeDtypeStruct((bs, outp), jnp.float32),
        grid_spec=pltpu.PrefetchScalarGridSpec(
            num_scalar_prefetch=0,
            grid=(num_layers, e_pad // edge_tile),
            in_specs=in_specs,
            out_specs=pl.BlockSpec((bs, outp), lambda l, t: (0, 0)),
            scratch_shapes=[pltpu.VMEM((n, feat), jnp.float32),   # hidden state h
                            pltpu.VMEM((n, hp), jnp.float32)]),   # layer accumulator
        compiler_params=pltpu.CompilerParams(
            dimension_semantics=("arbitrary", "arbitrary"),
            vmem_limit_bytes=48 * 1024 * 1024),
    )(x_p, src_p, dst_p, ea_p, wbig_all, wroot_all, bias_all, w1p, b1p, w2p, b2p)

    return out_p[:, :output_dim]   # slice lane padding outside the kernel


# ------------------------------ pure-JAX reference ------------------------- #

def reference_forward(x, edge_index, edge_attr, batch, params, *, hidden_dim, bs):
    del batch
    src, dst = edge_index[0], edge_index[1]
    e = src.shape[0]
    ea = edge_attr * jnp.ones((e,), jnp.float32)[:, None]
    h = x
    for lp in params["convs"]:
        din = h.shape[1]
        w_edge = (ea @ lp["theta_w"] + lp["theta_b"]).reshape(e, din, hidden_dim)
        msg = jnp.einsum("ed,edh->eh", h[src], w_edge)
        agg = jnp.zeros((h.shape[0], hidden_dim), jnp.float32).at[dst].add(msg)
        h = jnp.maximum(h @ lp["w_root"] + agg + lp["bias"], 0.0)
    xg = h.reshape(bs, -1, hidden_dim)
    g = jnp.concatenate([xg.max(axis=1), xg.sum(axis=1)], axis=-1)
    hh = jnp.maximum(g @ params["w1"] + params["b1"], 0.0)
    logits = hh @ params["w2"] + params["b2"]
    return jax.nn.log_softmax(logits, axis=-1)


# ----------------------------------- main ----------------------------------- #

if __name__ == "__main__":
    key = jax.random.PRNGKey(0)

    # small shapes consistent with the module
    bs, num_node = 2, 8
    n_nodes = bs * num_node                 # 16 nodes total
    input_dim, hidden_dim, output_dim = 4, 32, 3
    edge_dim, num_layers = 4, 2
    n_edges = 32

    key, kx, ke, ks, kd = jax.random.split(key, 5)
    x = jax.random.normal(kx, (n_nodes, input_dim), jnp.float32)
    edge_attr = jax.random.normal(ke, (n_edges, edge_dim), jnp.float32)
    # edges stay within each graph (nodes 0..7 -> graph 0, 8..15 -> graph 1)
    src0 = jax.random.randint(ks, (n_edges // 2,), 0, num_node)
    dst0 = jax.random.randint(kd, (n_edges // 2,), 0, num_node)
    src = jnp.concatenate([src0, src0 + num_node]).astype(jnp.int32)
    dst = jnp.concatenate([dst0, dst0 + num_node]).astype(jnp.int32)
    edge_index = jnp.stack([src, dst], axis=0)
    batch = jnp.repeat(jnp.arange(bs, dtype=jnp.int32), num_node)

    params = init_params(jax.random.PRNGKey(0), input_dim, hidden_dim,
                         output_dim, edge_dim, num_layers)

    fwd = jax.jit(gnn_basic_forward,
                  static_argnames=("hidden_dim", "output_dim", "bs"))
    out = fwd(x, edge_index, edge_attr, batch, params,
              hidden_dim=hidden_dim, output_dim=output_dim, bs=bs)
    out = jax.block_until_ready(out)

    ref = reference_forward(x, edge_index, edge_attr, batch, params,
                            hidden_dim=hidden_dim, bs=bs)
    # bf16 MXU operands (f32 accumulate) in the conv path -> loosened tolerance
    # per the performance review; f32 reference remains the ground truth.
    np.testing.assert_allclose(np.asarray(out), np.asarray(ref),
                               rtol=5e-2, atol=5e-2)
    print("KERNEL_OK")
</pallas_src>

<mosaic_0001>
module attributes {stable_mosaic.version = 11 : i64} {
  func.func @kernel(%arg0: i32, %arg1: i32, %arg2: memref<16x128xf32, #tpu.memory_space<vmem>>, %arg3: memref<128x1xi32, #tpu.memory_space<vmem>>, %arg4: memref<1x128xi32, #tpu.memory_space<vmem>>, %arg5: memref<128x128xf32, #tpu.memory_space<vmem>>, %arg6: memref<1x640x128xbf16, #tpu.memory_space<vmem>>, %arg7: memref<1x128x128xbf16, #tpu.memory_space<vmem>>, %arg8: memref<1x1x128xf32, #tpu.memory_space<vmem>>, %arg9: memref<256x128xf32, #tpu.memory_space<vmem>>, %arg10: memref<1x128xf32, #tpu.memory_space<vmem>>, %arg11: memref<128x128xf32, #tpu.memory_space<vmem>>, %arg12: memref<1x128xf32, #tpu.memory_space<vmem>>, %arg13: memref<2x128xf32, #tpu.memory_space<vmem>>, %arg14: memref<16x128xf32, #tpu.memory_space<vmem>>, %arg15: memref<16x128xf32, #tpu.memory_space<vmem>>) attributes {dimension_semantics = [#tpu.dimension_semantics<arbitrary>, #tpu.dimension_semantics<arbitrary>], iteration_bounds = array<i64: 2, 1>, scalar_prefetch = 0 : i64, scratch_operands = 2 : i64, tpu.core_type = #tpu.core_type<tc>, window_params = [{pipeline_mode = #tpu.pipeline_mode<synchronous>, transform_indices = @transform_0, window_bounds = array<i64: 16, 128>}, {transform_indices = @transform_1, window_bounds = array<i64: 128, 1>}, {transform_indices = @transform_2, window_bounds = array<i64: 1, 128>}, {transform_indices = @transform_3, window_bounds = array<i64: 128, 128>}, {transform_indices = @transform_4, window_bounds = array<i64: 1, 640, 128>}, {transform_indices = @transform_5, window_bounds = array<i64: 1, 128, 128>}, {transform_indices = @transform_6, window_bounds = array<i64: 1, 1, 128>}, {pipeline_mode = #tpu.pipeline_mode<synchronous>, transform_indices = @transform_7, window_bounds = array<i64: 256, 128>}, {pipeline_mode = #tpu.pipeline_mode<synchronous>, transform_indices = @transform_8, window_bounds = array<i64: 1, 128>}, {pipeline_mode = #tpu.pipeline_mode<synchronous>, transform_indices = @transform_9, window_bounds = array<i64: 128, 128>}, {pipeline_mode = #tpu.pipeline_mode<synchronous>, transform_indices = @transform_10, window_bounds = array<i64: 1, 128>}, {pipeline_mode = #tpu.pipeline_mode<synchronous>, transform_indices = @transform_11, window_bounds = array<i64: 2, 128>}]} {
    %c0_i32 = arith.constant 0 : i32
    %0 = arith.cmpi eq, %arg0, %c0_i32 : i32
    %c0_i32_0 = arith.constant 0 : i32
    %1 = arith.cmpi eq, %arg1, %c0_i32_0 : i32
    %2 = arith.andi %0, %1 : i1
    %3 = arith.extui %2 : i1 to i32
    %c0_i32_1 = arith.constant 0 : i32
    %4 = arith.cmpi ne, %3, %c0_i32_1 : i32
    scf.if %4 {
      %c0_26 = arith.constant 0 : index
      %c0_27 = arith.constant 0 : index
      %53 = vector.load %arg2[%c0_26, %c0_27] : memref<16x128xf32, #tpu.memory_space<vmem>>, vector<16x128xf32>
      %c0_28 = arith.constant 0 : index
      %c0_29 = arith.constant 0 : index
      %54 = vector.load %arg14[%c0_28, %c0_29] : memref<16x128xf32, #tpu.memory_space<vmem>>, vector<16x128xf32>
      tpu.vector_store %arg14[%c0_28, %c0_29], %53 {strides = array<i32>} : memref<16x128xf32, #tpu.memory_space<vmem>>, vector<16x128xf32>,
    } else {
    }
    %c0_i32_2 = arith.constant 0 : i32
    %5 = arith.cmpi eq, %arg1, %c0_i32_2 : i32
    %6 = arith.extui %5 : i1 to i32
    %c0_i32_3 = arith.constant 0 : i32
    %7 = arith.cmpi ne, %6, %c0_i32_3 : i32
    scf.if %7 {
      %c0_26 = arith.constant 0 : index
      %c0_27 = arith.constant 0 : index
      %53 = vector.load %arg14[%c0_26, %c0_27] : memref<16x128xf32, #tpu.memory_space<vmem>>, vector<16x128xf32>
      %54 = arith.truncf %53 : vector<16x128xf32> to vector<16x128xbf16>
      %c0_28 = arith.constant 0 : index
      %c0_29 = arith.constant 0 : index
      %c0_30 = arith.constant 0 : index
      %55 = vector.load %arg7[%c0_28, %c0_29, %c0_30] : memref<1x128x128xbf16, #tpu.memory_space<vmem>>, vector<1x128x128xbf16>
      %56 = vector.shape_cast %55 : vector<1x128x128xbf16> to vector<128x128xbf16>
      %cst_31 = arith.constant dense<0.000000e+00> : vector<16x128xf32>
      %57 = tpu.matmul %54, %56, %cst_31 {dimension_numbers = #tpu.dot_dimension_numbers<[1], [0], [0], [1], [0, 0, 1, 1], [], []>} : vector<16x128xbf16>, vector<128x128xbf16>, vector<16x128xf32> -> vector<16x128xf32>
      %c0_32 = arith.constant 0 : index
      %c0_33 = arith.constant 0 : index
      %c0_34 = arith.constant 0 : index
      %58 = vector.load %arg8[%c0_32, %c0_33, %c0_34] : memref<1x1x128xf32, #tpu.memory_space<vmem>>, vector<1x1x128xf32>
      %59 = vector.shape_cast %58 : vector<1x1x128xf32> to vector<1x128xf32>
      %60 = vector.broadcast %59 : vector<1x128xf32> to vector<16x128xf32>
      %61 = arith.addf %57, %60 : vector<16x128xf32>
      %c0_35 = arith.constant 0 : index
      %c0_36 = arith.constant 0 : index
      %62 = vector.load %arg15[%c0_35, %c0_36] : memref<16x128xf32, #tpu.memory_space<vmem>>, vector<16x128xf32>
      tpu.vector_store %arg15[%c0_35, %c0_36], %61 {strides = array<i32>} : memref<16x128xf32, #tpu.memory_space<vmem>>, vector<16x128xf32>,
    } else {
    }
    %c0 = arith.constant 0 : index
    %c0_4 = arith.constant 0 : index
    %8 = vector.load %arg14[%c0, %c0_4] : memref<16x128xf32, #tpu.memory_space<vmem>>, vector<16x128xf32>
    %9 = arith.truncf %8 : vector<16x128xf32> to vector<16x128xbf16>
    %c0_5 = arith.constant 0 : index
    %c0_6 = arith.constant 0 : index
    %10 = vector.load %arg3[%c0_5, %c0_6] : memref<128x1xi32, #tpu.memory_space<vmem>>, vector<128x1xi32>
    %c0_7 = arith.constant 0 : index
    %c0_8 = arith.constant 0 : index
    %11 = vector.load %arg4[%c0_7, %c0_8] : memref<1x128xi32, #tpu.memory_space<vmem>>, vector<1x128xi32>
    %c0_9 = arith.constant 0 : index
    %c0_10 = arith.constant 0 : index
    %12 = vector.load %arg5[%c0_9, %c0_10] : memref<128x128xf32, #tpu.memory_space<vmem>>, vector<128x128xf32>
    %13 = tpu.iota {dimensions = array<i32: 1>} : vector<128x16xi32>
    %14 = vector.broadcast %10 : vector<128x1xi32> to vector<128x16xi32>
    %15 = arith.cmpi eq, %13, %14 : vector<128x16xi32>
    %cst = arith.constant 1.000000e+00 : f32
    %cst_11 = arith.constant 0.000000e+00 : f32
    %16 = vector.broadcast %cst : f32 to vector<128x16xf32>
    %17 = vector.broadcast %cst_11 : f32 to vector<128x16xf32>
    %18 = arith.select %15, %16, %17 : vector<128x16xi1>, vector<128x16xf32>
    %19 = arith.truncf %18 : vector<128x16xf32> to vector<128x16xbf16>
    %cst_12 = arith.constant dense<0.000000e+00> : vector<128x128xf32>
    %20 = tpu.matmul %19, %9, %cst_12 {dimension_numbers = #tpu.dot_dimension_numbers<[1], [0], [0], [1], [0, 0, 1, 1], [], []>} : vector<128x16xbf16>, vector<16x128xbf16>, vector<128x128xf32> -> vector<128x128xf32>
    %21 = vector.extract_strided_slice %12 {offsets = [0, 0], sizes = [128, 1], strides = [1, 1]} : vector<128x128xf32> to vector<128x1xf32>
    %22 = vector.broadcast %21 : vector<128x1xf32> to vector<128x128xf32>
    %23 = arith.mulf %20, %22 : vector<128x128xf32>
    %24 = vector.extract_strided_slice %12 {offsets = [0, 1], sizes = [128, 1], strides = [1, 1]} : vector<128x128xf32> to vector<128x1xf32>
    %25 = vector.broadcast %24 : vector<128x1xf32> to vector<128x128xf32>
    %26 = arith.mulf %20, %25 : vector<128x128xf32>
    %27 = vector.extract_strided_slice %12 {offsets = [0, 2], sizes = [128, 1], strides = [1, 1]} : vector<128x128xf32> to vector<128x1xf32>
    %28 = vector.broadcast %27 : vector<128x1xf32> to vector<128x128xf32>
    %29 = arith.mulf %20, %28 : vector<128x128xf32>
    %30 = vector.extract_strided_slice %12 {offsets = [0, 3], sizes = [128, 1], strides = [1, 1]} : vector<128x128xf32> to vector<128x1xf32>
    %31 = vector.broadcast %30 : vector<128x1xf32> to vector<128x128xf32>
    %32 = arith.mulf %20, %31 : vector<128x128xf32>
    %33 = tpu.concatenate %20, %23, %26, %29, %32 in 1 : vector<128x128xf32>, vector<128x128xf32>, vector<128x128xf32>, vector<128x128xf32>, vector<128x128xf32> -> vector<128x640xf32>
    %34 = arith.truncf %33 : vector<128x640xf32> to vector<128x640xbf16>
    %c0_13 = arith.constant 0 : index
    %c0_14 = arith.constant 0 : index
    %c0_15 = arith.constant 0 : index
    %35 = vector.load %arg6[%c0_13, %c0_14, %c0_15] : memref<1x640x128xbf16, #tpu.memory_space<vmem>>, vector<1x640x128xbf16>
    %36 = vector.shape_cast %35 : vector<1x640x128xbf16> to vector<640x128xbf16>
    %cst_16 = arith.constant dense<0.000000e+00> : vector<128x128xf32>
    %37 = tpu.matmul %34, %36, %cst_16 {dimension_numbers = #tpu.dot_dimension_numbers<[1], [0], [0], [1], [0, 0, 1, 1], [], []>} : vector<128x640xbf16>, vector<640x128xbf16>, vector<128x128xf32> -> vector<128x128xf32>
    %38 = tpu.iota {dimensions = array<i32: 0>} : vector<16x128xi32>
    %39 = vector.broadcast %11 : vector<1x128xi32> to vector<16x128xi32>
    %40 = arith.cmpi eq, %38, %39 : vector<16x128xi32>
    %cst_17 = arith.constant 1.000000e+00 : f32
    %cst_18 = arith.constant 0.000000e+00 : f32
    %41 = vector.broadcast %cst_17 : f32 to vector<16x128xf32>
    %42 = vector.broadcast %cst_18 : f32 to vector<16x128xf32>
    %43 = arith.select %40, %41, %42 : vector<16x128xi1>, vector<16x128xf32>
    %44 = arith.truncf %43 : vector<16x128xf32> to vector<16x128xbf16>
    %c0_19 = arith.constant 0 : index
    %c0_20 = arith.constant 0 : index
    %45 = vector.load %arg15[%c0_19, %c0_20] : memref<16x128xf32, #tpu.memory_space<vmem>>, vector<16x128xf32>
    %46 = arith.truncf %37 : vector<128x128xf32> to vector<128x128xbf16>
    %cst_21 = arith.constant dense<0.000000e+00> : vector<16x128xf32>
    %47 = tpu.matmul %44, %46, %cst_21 {dimension_numbers = #tpu.dot_dimension_numbers<[1], [0], [0], [1], [0, 0, 1, 1], [], []>} : vector<16x128xbf16>, vector<128x128xbf16>, vector<16x128xf32> -> vector<16x128xf32>
    %48 = arith.addf %45, %47 : vector<16x128xf32>
    %c0_22 = arith.constant 0 : index
    %c0_23 = arith.constant 0 : index
    %49 = vector.load %arg15[%c0_22, %c0_23] : memref<16x128xf32, #tpu.memory_space<vmem>>, vector<16x128xf32>
    tpu.vector_store %arg15[%c0_22, %c0_23], %48 {strides = array<i32>} : memref<16x128xf32, #tpu.memory_space<vmem>>, vector<16x128xf32>,
    %c0_i32_24 = arith.constant 0 : i32
    %50 = arith.cmpi eq, %arg1, %c0_i32_24 : i32
    %51 = arith.extui %50 : i1 to i32
    %c0_i32_25 = arith.constant 0 : i32
    %52 = arith.cmpi ne, %51, %c0_i32_25 : i32
    scf.if %52 {
      %c0_26 = arith.constant 0 : index
      %c0_27 = arith.constant 0 : index
      %53 = vector.load %arg15[%c0_26, %c0_27] : memref<16x128xf32, #tpu.memory_space<vmem>>, vector<16x128xf32>
      %cst_28 = arith.constant 0.000000e+00 : f32
      %54 = vector.broadcast %cst_28 : f32 to vector<16x128xf32>
      %55 = arith.maximumf %53, %54 : vector<16x128xf32>
      %c1_i32 = arith.constant 1 : i32
      %56 = arith.cmpi slt, %arg0, %c1_i32 : i32
      %57 = arith.extui %56 : i1 to i32
      %c0_i32_29 = arith.constant 0 : i32
      %58 = arith.cmpi ne, %57, %c0_i32_29 : i32
      scf.if %58 {
        %c0_32 = arith.constant 0 : index
        %c0_33 = arith.constant 0 : index
        %62 = vector.load %arg14[%c0_32, %c0_33] : memref<16x128xf32, #tpu.memory_space<vmem>>, vector<16x128xf32>
        tpu.vector_store %arg14[%c0_32, %c0_33], %55 {strides = array<i32>} : memref<16x128xf32, #tpu.memory_space<vmem>>, vector<16x128xf32>,
      } else {
      }
      %c1_i32_30 = arith.constant 1 : i32
      %59 = arith.cmpi eq, %arg0, %c1_i32_30 : i32
      %60 = arith.extui %59 : i1 to i32
      %c0_i32_31 = arith.constant 0 : i32
      %61 = arith.cmpi ne, %60, %c0_i32_31 : i32
      scf.if %61 {
        %62 = vector.shape_cast %55 : vector<16x128xf32> to vector<2x8x128xf32>
        %cst_32 = arith.constant dense<0xFF800000> : vector<2x128xf32>
        %63 = vector.multi_reduction <maximumf>, %62, %cst_32 [1] : vector<2x8x128xf32> to vector<2x128xf32>
        %cst_33 = arith.constant dense<0.000000e+00> : vector<2x128xf32>
        %64 = vector.multi_reduction <add>, %62, %cst_33 [1] : vector<2x8x128xf32> to vector<2x128xf32>
        %65 = tpu.concatenate %63, %64 in 1 : vector<2x128xf32>, vector<2x128xf32> -> vector<2x256xf32>
        %c0_34 = arith.constant 0 : index
        %c0_35 = arith.constant 0 : index
        %66 = vector.load %arg9[%c0_34, %c0_35] : memref<256x128xf32, #tpu.memory_space<vmem>>, vector<256x128xf32>
        %cst_36 = arith.constant dense<0.000000e+00> : vector<2x128xf32>
        %67 = tpu.matmul %65, %66, %cst_36 {dimension_numbers = #tpu.dot_dimension_numbers<[1], [0], [0], [1], [0, 0, 1, 1], [], []>} : vector<2x256xf32>, vector<256x128xf32>, vector<2x128xf32> -> vector<2x128xf32>
        %c0_37 = arith.constant 0 : index
        %c0_38 = arith.constant 0 : index
        %68 = vector.load %arg10[%c0_37, %c0_38] : memref<1x128xf32, #tpu.memory_space<vmem>>, vector<1x128xf32>
        %69 = vector.broadcast %68 : vector<1x128xf32> to vector<2x128xf32>
        %70 = arith.addf %67, %69 : vector<2x128xf32>
        %cst_39 = arith.constant 0.000000e+00 : f32
        %71 = vector.broadcast %cst_39 : f32 to vector<2x128xf32>
        %72 = arith.maximumf %70, %71 : vector<2x128xf32>
        %c0_40 = arith.constant 0 : index
        %c0_41 = arith.constant 0 : index
        %73 = vector.load %arg11[%c0_40, %c0_41] : memref<128x128xf32, #tpu.memory_space<vmem>>, vector<128x128xf32>
        %cst_42 = arith.constant dense<0.000000e+00> : vector<2x128xf32>
        %74 = tpu.matmul %72, %73, %cst_42 {dimension_numbers = #tpu.dot_dimension_numbers<[1], [0], [0], [1], [0, 0, 1, 1], [], []>} : vector<2x128xf32>, vector<128x128xf32>, vector<2x128xf32> -> vector<2x128xf32>
        %c0_43 = arith.constant 0 : index
        %c0_44 = arith.constant 0 : index
        %75 = vector.load %arg12[%c0_43, %c0_44] : memref<1x128xf32, #tpu.memory_space<vmem>>, vector<1x128xf32>
        %76 = vector.broadcast %75 : vector<1x128xf32> to vector<2x128xf32>
        %77 = arith.addf %74, %76 : vector<2x128xf32>
        %78 = tpu.iota {dimensions = array<i32: 1>} : vector<2x128xi32>
        %c3_i32 = arith.constant 3 : i32
        %79 = vector.broadcast %c3_i32 : i32 to vector<2x128xi32>
        %80 = arith.cmpi slt, %78, %79 : vector<2x128xi32>
        %cst_45 = arith.constant -1.000000e+30 : f32
        %81 = vector.broadcast %cst_45 : f32 to vector<2x128xf32>
        %82 = arith.select %80, %77, %81 : vector<2x128xi1>, vector<2x128xf32>
        %cst_46 = arith.constant dense<0xFF800000> : vector<2xf32>
        %83 = vector.multi_reduction <maximumf>, %82, %cst_46 [1] : vector<2x128xf32> to vector<2xf32>
        %84 = vector.shape_cast %83 : vector<2xf32> to vector<2x1xf32>
        %85 = vector.broadcast %84 : vector<2x1xf32> to vector<2x128xf32>
        %86 = arith.subf %82, %85 : vector<2x128xf32>
        %87 = math.exp %86 : vector<2x128xf32>
        %cst_47 = arith.constant 0.000000e+00 : f32
        %88 = vector.broadcast %cst_47 : f32 to vector<2x128xf32>
        %89 = arith.select %80, %87, %88 : vector<2x128xi1>, vector<2x128xf32>
        %cst_48 = arith.constant dense<0.000000e+00> : vector<2xf32>
        %90 = vector.multi_reduction <add>, %89, %cst_48 [1] : vector<2x128xf32> to vector<2xf32>
        %91 = vector.shape_cast %90 : vector<2xf32> to vector<2x1xf32>
        %92 = math.log %91 : vector<2x1xf32>
        %93 = arith.addf %92, %84 : vector<2x1xf32>
        %94 = vector.broadcast %93 : vector<2x1xf32> to vector<2x128xf32>
        %95 = arith.subf %82, %94 : vector<2x128xf32>
        %c0_49 = arith.constant 0 : index
        %c0_50 = arith.constant 0 : index
        %96 = vector.load %arg13[%c0_49, %c0_50] : memref<2x128xf32, #tpu.memory_space<vmem>>, vector<2x128xf32>
        tpu.vector_store %arg13[%c0_49, %c0_50], %95 {strides = array<i32>} : memref<2x128xf32, #tpu.memory_space<vmem>>, vector<2x128xf32>,
      } else {
      }
    } else {
    }
    return
  }
  func.func @transform_0(%arg0: i32, %arg1: i32) -> (i32, i32) {
    %c0_i32 = arith.constant 0 : i32
    %c0_i32_0 = arith.constant 0 : i32
    %c0_i32_1 = arith.constant 0 : i32
    return %c0_i32, %c0_i32_0 : i32, i32
  }
  func.func @transform_1(%arg0: i32, %arg1: i32) -> (i32, i32) {
    %c0_i32 = arith.constant 0 : i32
    %c0_i32_0 = arith.constant 0 : i32
    return %arg1, %c0_i32 : i32, i32
  }
  func.func @transform_2(%arg0: i32, %arg1: i32) -> (i32, i32) {
    %c0_i32 = arith.constant 0 : i32
    %c0_i32_0 = arith.constant 0 : i32
    return %c0_i32, %arg1 : i32, i32
  }
  func.func @transform_3(%arg0: i32, %arg1: i32) -> (i32, i32) {
    %c0_i32 = arith.constant 0 : i32
    %c0_i32_0 = arith.constant 0 : i32
    return %arg1, %c0_i32 : i32, i32
  }
  func.func @transform_4(%arg0: i32, %arg1: i32) -> (i32, i32, i32) {
    %c0_i32 = arith.constant 0 : i32
    %c0_i32_0 = arith.constant 0 : i32
    %c0_i32_1 = arith.constant 0 : i32
    return %arg0, %c0_i32, %c0_i32_0 : i32, i32, i32
  }
  func.func @transform_5(%arg0: i32, %arg1: i32) -> (i32, i32, i32) {
    %c0_i32 = arith.constant 0 : i32
    %c0_i32_0 = arith.constant 0 : i32
    %c0_i32_1 = arith.constant 0 : i32
    return %arg0, %c0_i32, %c0_i32_0 : i32, i32, i32
  }
  func.func @transform_6(%arg0: i32, %arg1: i32) -> (i32, i32, i32) {
    %c0_i32 = arith.constant 0 : i32
    %c0_i32_0 = arith.constant 0 : i32
    %c0_i32_1 = arith.constant 0 : i32
    return %arg0, %c0_i32, %c0_i32_0 : i32, i32, i32
  }
  func.func @transform_7(%arg0: i32, %arg1: i32) -> (i32, i32) {
    %c0_i32 = arith.constant 0 : i32
    %c0_i32_0 = arith.constant 0 : i32
    %c0_i32_1 = arith.constant 0 : i32
    return %c0_i32, %c0_i32_0 : i32, i32
  }
  func.func @transform_8(%arg0: i32, %arg1: i32) -> (i32, i32) {
    %c0_i32 = arith.constant 0 : i32
    %c0_i32_0 = arith.constant 0 : i32
    %c0_i32_1 = arith.constant 0 : i32
    return %c0_i32, %c0_i32_0 : i32, i32
  }
  func.func @transform_9(%arg0: i32, %arg1: i32) -> (i32, i32) {
    %c0_i32 = arith.constant 0 : i32
    %c0_i32_0 = arith.constant 0 : i32
    %c0_i32_1 = arith.constant 0 : i32
    return %c0_i32, %c0_i32_0 : i32, i32
  }
  func.func @transform_10(%arg0: i32, %arg1: i32) -> (i32, i32) {
    %c0_i32 = arith.constant 0 : i32
    %c0_i32_0 = arith.constant 0 : i32
    %c0_i32_1 = arith.constant 0 : i32
    return %c0_i32, %c0_i32_0 : i32, i32
  }
  func.func @transform_11(%arg0: i32, %arg1: i32) -> (i32, i32) {
    %c0_i32 = arith.constant 0 : i32
    %c0_i32_0 = arith.constant 0 : i32
    %c0_i32_1 = arith.constant 0 : i32
    return %c0_i32, %c0_i32_0 : i32, i32
  }
}

</mosaic_0001>

<bundles_post_ra>
// kernel: gnn_basic_forward.1
= control target key start
LH: loop header
LB: loop body
LE: loop exit
PB: predicated region body
PF: predicated region fallthrough
CT: control target
= control target key end

     0   :  { %16 = vsyncpa [#allocation5], 0  ;;  %s3043_s17 = smov 0   ;;  %s3045_s18 = smov 0   ;;  %s4017_s0 = inlined_call_operand.vmem [shape: f32[16,128], index: 0, kind: input, shape index: {}]   ;;  %s4018_s1 = inlined_call_operand.vmem [shape: s32[128,1], index: 1, kind: input, shape index: {}]   ;;  %s4019_s2 = inlined_call_operand.vmem [shape: s32[1,128], index: 2, kind: input, shape index: {}]   ;;  %s4020_s3 = inlined_call_operand.vmem [shape: f32[128,128], index: 3, kind: input, shape index: {}]   ;;  %s4021_s4 = inlined_call_operand.vmem [shape: bf16[2,640,128], index: 4, kind: input, shape index: {}]   ;;  %s4022_s5 = inlined_call_operand.vmem [shape: bf16[2,128,128], index: 5, kind: input, shape index: {}]   ;;  %s4023_s6 = inlined_call_operand.vmem [shape: f32[2,1,128], index: 6, kind: input, shape index: {}]   ;;  %s4024_s7 = inlined_call_operand.vmem [shape: f32[256,128], index: 7, kind: input, shape index: {}]   ;;  %s4025_s8 = inlined_call_operand.vmem [shape: f32[1,128], index: 8, kind: input, shape index: {}]   ;;  %s4026_s9 = inlined_call_operand.vmem [shape: f32[128,128], index: 9, kind: input, shape index: {}]   ;;  %s4027_s10 = inlined_call_operand.vmem [shape: f32[1,128], index: 10, kind: input, shape index: {}]   ;;  %s4028_s11 = inlined_call_operand.hbm [shape: f32[2,128], index: 11, kind: output, shape index: {}]  }
   0x1   :  { %s3047_s19 = smov 0  }
   0x2 LB: > { %s34_s21 = sadd.s32 1, %s2966_s18  ;;  %p2305_p1 = scmp.ge.s32.totalorder %s2970_s19, 1  ;;  %s2970_s19 = sphi %s3047_s19, %s22_s19   ;;  %s2966_s18 = sphi %s3045_s18, %s4075_s18   ;;  %s2962_s17 = sphi %s3043_s17, %s4074_s17  }
   0x3   : > { %p36_p0 = scmp.ge.s32.totalorder %s34_s21, 2  ;;  %p393_p2 = scmp.lt.s32.totalorder %s2970_s19, 3 }
   0x5   : > { %s4077_s21 = smov (%p36_p0, %s34_s21), 0  ;;  %p394_p3 = pnand %p2305_p1, %p393_p2 }
   0x6   : > { %4034 = sst [smem:[#allocation7_spill]] %s4077_s21 }
   0x7   : > { %397 = sbr.rel (%p394_p3) target bundleno = 1732 (0x6c4), region = 64 }
   0xe   : > { %p464_p4 = scmp.lt.s32.totalorder %s2962_s17, 1  ;;  %p478_p5 = scmp.eq.s32.totalorder %s2962_s17, 0 }
   0xf   : > { %v484_v0 = vld [vmem:[%s4017_s0] sm:$0xff] (%p478_p5)  ;;  %v485_v1 = vld [vmem:[%s4017_s0 + $0x8] sm:$0xff] (%p478_p5) }
  0x10   : > { %s3067_s22 = scalar_select %p464_p4, %s2962_s17, 1 }
  0x11   : > { %483 = sbr.rel (!%p478_p5) target bundleno = 24 (0x18), region = 68  ;;  %486 = vst [vmem:[#allocation2] sm:$0xff] (%p478_p5), %v484_v0  ;;  %487 = vst [vmem:[#allocation2 + $0x8] sm:$0xff] (%p478_p5), %v485_v1 }
  0x12   : > { %s2790_s23 = smul.u32 320, %s3067_s22  ;;  %s2378_s24 = sshll.u32 %s3067_s22, 6 }
  0x13   : > { %s3074_s27 = scalar_lea.vmem %s4022_s5, %s2378_s24  ;;  %s476_s30 = scalar_lea.vmem %s4023_s6, %s3067_s22 }
  0x14   : > { %s3083_s14 = scalar_lea.vmem %s4021_s4, %s2790_s23 }
  0x18 PF: > { %v613_v2 = vld [vmem:[%s4018_s1 + $0x10] sm:$0xff]  ;;  %v611_v3 = vld [vmem:[%s4018_s1] sm:$0xff]  ;;  %v2972_v4 = vmov 0   ;;  %v614_v5 = vld [vmem:[%s4018_s1 + $0x18] sm:$0xff]  ;;  %v4030_v7 = vmov 0.0   ;;  %v2974_v33 = vmov 2   ;;  %v4029_v43 = vlaneseq }
  0x19   : > { %2833 = vset.pattern.permute.xlu1 %v2972_v4  ;;  %2832 = vset.pattern.permute.xlu0 %v2972_v4  ;;  %v612_v6 = vld [vmem:[%s4018_s1 + $0x8] sm:$0xff]  ;;  %v615_v9 = vld [vmem:[%s4018_s1 + $0x20] sm:$0xff]  ;;  %v618_v10 = vld [vmem:[%s4018_s1 + $0x38] sm:$0xff]  ;;  %v2975_v34 = vmov 1   ;;  %v2976_v36 = vmov 3   ;;  %vm734_vm4 = vcmask 130048  }
  0x1a   : > { %653 = vperm.xlu1 %2833, %v613_v2   ;;  %647 = vperm.xlu0 %2832, %v611_v3   ;;  %v616_v8 = vld [vmem:[%s4018_s1 + $0x28] sm:$0xff]  ;;  %v608_v11 = vld [vmem:[#allocation2] sm:$0xff]  ;;  %v617_v13 = vld [vmem:[%s4018_s1 + $0x30] sm:$0xff]  ;;  %v3273_v45 = vand.u32 127, %v4029_v43  ;;  %vm2977_vm15 = vmmov 0   ;;  %p2370_p6 = scmp.ge.s32.totalorder %s2962_s17, 1 }
  0x1b   : > { %2603 = vmatprep.subr.bf16.mxu0 %v4030_v7  ;;  %v609_v12 = vld [vmem:[#allocation2 + $0x8] sm:$0xff]  ;;  %v619_v16 = vld [vmem:[%s4018_s1 + $0x40] sm:$0xff]  ;;  %v622_v17 = vld [vmem:[%s4018_s1 + $0x58] sm:$0xff]  ;;  %2619 = vmatprep.mubr.msk.bf16.mxu0 %vm2977_vm15, %v4030_v7 }
  0x1c   : > { %v3118_v14 = vpack.c.bf16 %v609_v12, %v608_v11  ;;  %v620_v15 = vld [vmem:[%s4018_s1 + $0x48] sm:$0xff]  ;;  %v621_v18 = vld [vmem:[%s4018_s1 + $0x50] sm:$0xff]  ;;  %v623_v20 = vld [vmem:[%s4018_s1 + $0x60] sm:$0xff]  ;;  %4035 = vst [vmem:[#allocation8_spill] sm:$0xff] %v3273_v45 }
  0x1d   : > { %v624_v19 = vld [vmem:[%s4018_s1 + $0x68] sm:$0xff]  ;;  %v626_v21 = vld [vmem:[%s4018_s1 + $0x78] sm:$0xff]  ;;  %v625_v22 = vld [vmem:[%s4018_s1 + $0x70] sm:$0xff] }
  0x1e   : > { %656 = vperm.xlu1 %2833, %v614_v5   ;;  %650 = vperm.xlu0 %2832, %v612_v6   ;;  %v3149_v23 = vld [vmem:[%s4020_s3 + $0x8] sm:$0xff]  ;;  %v628_v24 = vld [vmem:[%s4020_s3] sm:$0xff]  ;;  %v3157_v25 = vld [vmem:[%s4020_s3 + $0x18] sm:$0xff] }
  0x1f   : > { %2623 = vmatprep.subr.bf16.mxu1 %v3118_v14  ;;  %v3162_v26 = vld [vmem:[%s4020_s3 + $0x10] sm:$0xff]  ;;  %v633_v27 = vld [vmem:[%s4020_s3 + $0x28] sm:$0xff]  ;;  %v3171_v28 = vld [vmem:[%s4020_s3 + $0x20] sm:$0xff] }
  0x20   : > { %2624 = vmatpush3.bf16.msra.mxu1 %v3118_v14  ;;  %v3178_v29 = vld [vmem:[%s4020_s3 + $0x38] sm:$0xff]  ;;  %v634_v30 = vld [vmem:[%s4020_s3 + $0x30] sm:$0xff]  ;;  %v3188_v31 = vld [vmem:[%s4020_s3 + $0x48] sm:$0xff] }
  0x21   : > { %v3193_v32 = vld [vmem:[%s4020_s3 + $0x40] sm:$0xff]  ;;  %v3205_v35 = vld [vmem:[%s4020_s3 + $0x50] sm:$0xff]  ;;  %v3213_v37 = vld [vmem:[%s4020_s3 + $0x58] sm:$0xff] }
  0x22   : > { %662 = vperm.xlu1 %2833, %v616_v8   ;;  %659 = vperm.xlu0 %2832, %v615_v9   ;;  %v3226_v38 = vld [vmem:[%s4020_s3 + $0x60] sm:$0xff]  ;;  %v3234_v39 = vld [vmem:[%s4020_s3 + $0x68] sm:$0xff]  ;;  %v3247_v40 = vld [vmem:[%s4020_s3 + $0x70] sm:$0xff] }
  0x23   : > { %v3255_v41 = vld [vmem:[%s4020_s3 + $0x78] sm:$0xff]  ;;  %v2866_v42 = vld [vmem:[%s3074_s27] sm:$0xff]   ;;  %v2867_v44 = vld [vmem:[%s3074_s27 + $0x8] sm:$0xff]  }
  0x24   : > { %2604 = vmatpush3.bf16.msra.mxu0 %v2866_v42  ;;  %v2868_v48 = vld [vmem:[%s3074_s27 + $0x10] sm:$0xff]   ;;  %v2869_v55 = vld [vmem:[%s3074_s27 + $0x18] sm:$0xff]   ;;  %v2870_v63 = vld [vmem:[%s3074_s27 + $0x20] sm:$0xff]  }
  0x25   : > { %2605 = vmatprep.subr.bf16.mxu0 %v4030_v7  ;;  %v2871_v5 = vld [vmem:[%s3074_s27 + $0x28] sm:$0xff]   ;;  %v2876_v42 = vld [vmem:[%s3083_s14] sm:$0xff]  }
  0x26   : > { %668 = vperm.xlu1 %2833, %v618_v10   ;;  %665 = vperm.xlu0 %2832, %v617_v13  }
  0x28   : > { %2606 = vmatpush3.bf16.msra.mxu0 %v2867_v44  ;;  %v2877_v44 = vld [vmem:[%s3083_s14 + $0x80] sm:$0xff]  }
  0x29   : > { %2607 = vmatprep.subr.bf16.mxu0 %v4030_v7 }
  0x2a   : > { %674 = vperm.xlu1 %2833, %v620_v15   ;;  %671 = vperm.xlu0 %2832, %v619_v16   ;;  %v2872_v15 = vld [vmem:[%s3074_s27 + $0x30] sm:$0xff]  }
  0x2c   : > { %2608 = vmatpush3.bf16.msra.mxu0 %v2868_v48  ;;  %v2879_v48 = vld [vmem:[%s3083_s14 + $0xc8] sm:$0xff]  }
  0x2d   : > { %2609 = vmatprep.subr.bf16.mxu0 %v4030_v7 }
  0x2e   : > { %680 = vperm.xlu1 %2833, %v622_v17   ;;  %677 = vperm.xlu0 %2832, %v621_v18  }
  0x30   : > { %2610 = vmatpush3.bf16.msra.mxu0 %v2869_v55  ;;  %v2886_v55 = vld [vmem:[%s3083_s14 + $0x58] sm:$0xff]  }
  0x31   : > { %2611 = vmatprep.subr.bf16.mxu0 %v4030_v7 }
  0x32   : > { %686 = vperm.xlu1 %2833, %v624_v19   ;;  %683 = vperm.xlu0 %2832, %v623_v20  }
  0x34   : > { %2612 = vmatpush3.bf16.msra.mxu0 %v2870_v63  ;;  %v2892_v63 = vld [vmem:[%s3083_s14 + $0x20] sm:$0xff]  }
  0x35   : > { %2613 = vmatprep.subr.bf16.mxu0 %v4030_v7 }
  0x36   : > { %692 = vperm.xlu1 %2833, %v626_v21   ;;  %689 = vperm.xlu0 %2832, %v625_v22   ;;  %v2873_v21 = vld [vmem:[%s3074_s27 + $0x38] sm:$0xff]   ;;  %v2874_v22 = vld [vmem:[%s3083_s14 + $0x40] sm:$0xff]  }
  0x37   : > { %2398 = vmatprep.subr.bf16.mxu1 %v2874_v22 }
  0x38   : > { %2614 = vmatpush3.bf16.msra.mxu0 %v2871_v5  ;;  %v2897_v5 = vld [vmem:[%s3083_s14 + $0xa8] sm:$0xff]  }
  0x39   : > { %2615 = vmatprep.subr.bf16.mxu0 %v4030_v7 }
  0x3a   : > { %863 = vperm.xlu1 %2833, %v3149_v23   ;;  %858 = vperm.xlu0 %2832, %v628_v24  }
  0x3c   : > { %2616 = vmatpush3.bf16.msra.mxu0 %v2872_v15  ;;  %v2904_v15 = vld [vmem:[%s3083_s14 + $0x38] sm:$0xff]  }
  0x3d   : > { %2617 = vmatprep.subr.bf16.mxu0 %v4030_v7 }
  0x3e   : > { %873 = vperm.xlu1 %2833, %v3157_v25   ;;  %868 = vperm.xlu0 %2832, %v3162_v26  }
  0x40   : > { %2618 = vmatpush3.bf16.msra.mxu0 %v2873_v21 }
  0x42   : > { %883 = vperm.xlu1 %2833, %v633_v27   ;;  %878 = vperm.xlu0 %2832, %v3171_v28  }
  0x43   : > { %2620 = vmatmul.mubr.bf16.vlgmr.msra.gmra.mrb[0].mxu0 %v3118_v14  ;;  %v2880_v14 = vld [vmem:[%s3083_s14 + $0x8] sm:$0xff]  }
  0x46   : > { %893 = vperm.xlu1 %2833, %v3178_v29   ;;  %888 = vperm.xlu0 %2832, %v634_v30  }
  0x4a   : > { %903 = vperm.xlu1 %2833, %v3188_v31   ;;  %898 = vperm.xlu0 %2832, %v3193_v32  }
  0x4e   : > { %2835 = vset.pattern.permute.xlu1 %v2974_v33  ;;  %2834 = vset.pattern.permute.xlu0 %v2974_v33 }
  0x4f   : > { %1037 = vperm.xlu1 %2835, %v3149_v23   ;;  %1033 = vperm.xlu0 %2834, %v628_v24  }
  0x53   : > { %2836 = vset.pattern.permute.xlu1 %v2975_v34  ;;  %1041 = vperm.xlu0 %2834, %v3162_v26  }
  0x54   : > { %953 = vperm.xlu1 %2836, %v628_v24  }
  0x57   : > { %2847 = vset.pattern.permute.xlu0 %v2976_v36 }
  0x58   : > { %2837 = vset.pattern.permute.xlu1 %v2972_v4  ;;  %1113 = vperm.xlu0 %2847, %v628_v24  }
  0x59   : > { %908 = vperm.xlu1 %2837, %v3205_v35  }
  0x5c   : > { %2848 = vset.pattern.permute.xlu0 %v2975_v34 }
  0x5d   : > { %913 = vperm.xlu1 %2837, %v3213_v37   ;;  %957 = vperm.xlu0 %2848, %v3149_v23  }
  0x61   : > { %2838 = vset.pattern.permute.xlu1 %v2974_v33  ;;  %965 = vperm.xlu0 %2848, %v3157_v25  }
  0x62   : > { %1045 = vperm.xlu1 %2838, %v3157_v25  }
  0x65   : > { %973 = vperm.xlu0 %2848, %v633_v27  }
  0x66   : > { %2839 = vset.pattern.permute.xlu1 %v2975_v34 }
  0x67   : > { %961 = vperm.xlu1 %2839, %v3162_v26  }
  0x69   : > { %981 = vperm.xlu0 %2848, %v3178_v29  }
  0x6b   : > { %2840 = vset.pattern.permute.xlu1 %v2972_v4 }
  0x6c   : > { %918 = vperm.xlu1 %2840, %v3226_v38  }
  0x6d   : > { %989 = vperm.xlu0 %2848, %v3188_v31  }
  0x70   : > { %923 = vperm.xlu1 %2840, %v3234_v39  }
  0x71   : > { %2851 = vset.pattern.permute.xlu0 %v2974_v33 }
  0x72   : > { %1049 = vperm.xlu0 %2851, %v3171_v28  }
  0x74   : > { %2841 = vset.pattern.permute.xlu1 %v2974_v33 }
  0x75   : > { %1053 = vperm.xlu1 %2841, %v633_v27  }
  0x76   : > { %1057 = vperm.xlu0 %2851, %v634_v30  }
  0x79   : > { %2842 = vset.pattern.permute.xlu1 %v2975_v34 }
  0x7a   : > { %969 = vperm.xlu1 %2842, %v3171_v28   ;;  %1073 = vperm.xlu0 %2851, %v3205_v35  }
  0x7e   : > { %2843 = vset.pattern.permute.xlu1 %v2972_v4  ;;  %1081 = vperm.xlu0 %2851, %v3226_v38  }
  0x7f   : > { %928 = vperm.xlu1 %2843, %v3247_v40  }
  0x82   : > { %1089 = vperm.xlu0 %2851, %v3247_v40  }
  0x83   : > { %933 = vperm.xlu1 %2843, %v3255_v41  }
  0x86   : > { %2861 = vset.pattern.permute.xlu0 %v2976_v36 }
  0x87   : > { %2844 = vset.pattern.permute.xlu1 %v2974_v33  ;;  %1133 = vperm.xlu0 %2861, %v633_v27  }
  0x88   : > { %1061 = vperm.xlu1 %2844, %v3178_v29  }
  0x8b   : > { %1137 = vperm.xlu0 %2861, %v634_v30  }
  0x8c   : > { %2845 = vset.pattern.permute.xlu1 %v2975_v34 }
  0x8d   : > { %977 = vperm.xlu1 %2845, %v634_v30  }
  0x8f   : > { %1149 = vperm.xlu0 %2861, %v3188_v31  }
  0x91   : > { %2846 = vset.pattern.permute.xlu1 %v2974_v33 }
  0x92   : > { %1065 = vperm.xlu1 %2846, %v3193_v32  }
  0x93   : > { %1153 = vperm.xlu0 %2861, %v3205_v35  }
  0x96   : > { %1069 = vperm.xlu1 %2846, %v3188_v31  }
  0x97   : > { %1165 = vperm.xlu0 %2861, %v3234_v39  }
  0x99   : > { %v654_v46 = vpop.permute.xlu1 %653  ;;  %v648_v47 = vpop.permute.xlu0 %647 }
  0x9a   : > { %2849 = vset.pattern.permute.xlu1 %v2976_v36  ;;  %vm696_vm0 = vcmp.eq.s32.totalorder %v3273_v45, %v654_v46  ;;  %vm694_vm1 = vcmp.eq.s32.totalorder %v3273_v45, %v648_v47  ;;  %v2878_v46 = vld [vmem:[%s3083_s14 + $0x48] sm:$0xff]  }
  0x9b   : > { %1117 = vperm.xlu1 %2849, %v3149_v23   ;;  %1169 = vperm.xlu0 %2861, %v3247_v40   ;;  %v712_v51 = vsel %vm696_vm0, 1.0, %v4030_v7  ;;  %v710_v52 = vsel %vm694_vm1, 1.0, %v4030_v7  ;;  %v2875_v23 = vld [vmem:[%s3083_s14 + $0xc0] sm:$0xff]  }
  0x9c   : > { %2462 = vmatprep.subr.bf16.mxu0 %v2875_v23 }
  0x9d   : > { %v657_v49 = vpop.permute.xlu1 %656  ;;  %v651_v50 = vpop.permute.xlu0 %650  ;;  %2463 = vmatpush3.bf16.msra.mxu0 %v2877_v44 }
  0x9e   : > { %vm697_vm2 = vcmp.eq.s32.totalorder %v3273_v45, %v657_v49  ;;  %vm695_vm3 = vcmp.eq.s32.totalorder %v3273_v45, %v651_v50  ;;  %2464 = vmatprep.subr.bf16.mxu0 %v2879_v48  ;;  %v2881_v50 = vld [vmem:[%s3083_s14 + $0x88] sm:$0xff]  }
  0x9f   : > { %v713_v53 = vsel %vm697_vm2, 1.0, %v4030_v7  ;;  %v711_v54 = vsel %vm695_vm3, 1.0, %v4030_v7  ;;  %2850 = vset.pattern.permute.xlu1 %v2975_v34 }
  0xa0   : > { %v727_v56 = vpack.c.bf16 %v713_v53, %v712_v51  ;;  %v726_v57 = vpack.c.bf16 %v711_v54, %v710_v52  ;;  %985 = vperm.xlu1 %2850, %v3193_v32   ;;  %v2882_v51 = vld [vmem:[%s3083_s14 + $0x50] sm:$0xff]  }
  0xa1   : > { %v663_v58 = vpop.permute.xlu1 %662  ;;  %v660_v59 = vpop.permute.xlu0 %659  ;;  %v2883_v52 = vld [vmem:[%s3083_s14 + $0xd0] sm:$0xff]   ;;  %2465 = vmatpush3.bf16.msra.mxu0 %v2881_v50 }
  0xa2   : > { %vm699_vm5 = vcmp.eq.s32.totalorder %v3273_v45, %v663_v58  ;;  %vm698_vm6 = vcmp.eq.s32.totalorder %v3273_v45, %v660_v59  ;;  %2625 = vmatprep.mubr.msk.bf16.mxu1 %vm734_vm4, %v726_v57  ;;  %2466 = vmatprep.subr.bf16.mxu0 %v2883_v52  ;;  %v2884_v53 = vld [vmem:[%s3083_s14 + $0x10] sm:$0xff]   ;;  %v2887_v57 = vld [vmem:[%s3083_s14 + $0xd8] sm:$0xff]  }
  0xa3   : > { %v715_v60 = vsel %vm699_vm5, 1.0, %v4030_v7  ;;  %v714_v61 = vsel %vm698_vm6, 1.0, %v4030_v7  ;;  %2626 = vmatmul.mubr.msk.bf16.vlgmr.msra.gmra.mrb[0].mxu1 %vm734_vm4, %v727_v56  ;;  %v2885_v54 = vld [vmem:[%s3083_s14 + $0x90] sm:$0xff]   ;;  %v2888_v59 = vld [vmem:[%s3083_s14 + $0x18] sm:$0xff]  }
  0xa4   : > { %v728_v62 = vpack.c.bf16 %v715_v60, %v714_v61  ;;  %2852 = vset.pattern.permute.xlu1 %v2976_v36  ;;  %2399 = vmatpush3.bf16.msra.mxu1 %v2876_v42  ;;  %v2889_v60 = vld [vmem:[%s3083_s14 + $0x98] sm:$0xff]   ;;  %v2890_v61 = vld [vmem:[%s3083_s14 + $0x60] sm:$0xff]  }
  0xa5   : > { %v669_v0 = vpop.permute.xlu1 %668  ;;  %v666_v1 = vpop.permute.xlu0 %665  ;;  %1121 = vperm.xlu1 %2852, %v3162_v26   ;;  %2400 = vmatprep.subr.bf16.mxu1 %v2878_v46 }
  0xa6   : > { %vm701_vm7 = vcmp.eq.s32.totalorder %v3273_v45, %v669_v0  ;;  %vm700_vm8 = vcmp.eq.s32.totalorder %v3273_v45, %v666_v1  ;;  %2629 = vmatprep.mubr.msk.bf16.mxu1 %vm734_vm4, %v728_v62  ;;  %2467 = vmatpush3.bf16.msra.mxu0 %v2885_v54  ;;  %v2891_v62 = vld [vmem:[%s3083_s14 + $0xe0] sm:$0xff]   ;;  %v2894_v1 = vld [vmem:[%s3083_s14 + $0x68] sm:$0xff]  }
  0xa7   : > { %v717_v2 = vsel %vm701_vm7, 1.0, %v4030_v7  ;;  %v716_v3 = vsel %vm700_vm8, 1.0, %v4030_v7  ;;  %2468 = vmatprep.subr.bf16.mxu0 %v2887_v57  ;;  %v2893_v0 = vld [vmem:[%s3083_s14 + $0xa0] sm:$0xff]  }
  0xa8   : > { %v729_v4 = vpack.c.bf16 %v717_v2, %v716_v3  ;;  %2401 = vmatpush3.bf16.msra.mxu1 %v2880_v14  ;;  %v2895_v2 = vld [vmem:[%s3083_s14 + $0xe8] sm:$0xff]  }
  0xa9   : > { %v675_v6 = vpop.permute.xlu1 %674  ;;  %v672_v8 = vpop.permute.xlu0 %671  ;;  %1125 = vperm.xlu1 %2852, %v3157_v25   ;;  %2402 = vmatprep.subr.bf16.mxu1 %v2882_v51 }
  0xaa   : > { %vm703_vm9 = vcmp.eq.s32.totalorder %v3273_v45, %v675_v6  ;;  %vm702_vm10 = vcmp.eq.s32.totalorder %v3273_v45, %v672_v8  ;;  %2469 = vmatpush3.bf16.msra.mxu0 %v2889_v60 }
  0xab   : > { %v719_v9 = vsel %vm703_vm9, 1.0, %v4030_v7  ;;  %v718_v10 = vsel %vm702_vm10, 1.0, %v4030_v7  ;;  %2630 = vmatmul.mubr.msk.bf16.gmra.mrb[4].mxu1 %vm734_vm4, %v729_v4  ;;  %2470 = vmatprep.subr.bf16.mxu0 %v2891_v62  ;;  %v2896_v4 = vld [vmem:[%s3083_s14 + $0x28] sm:$0xff]  }
  0xac   : > { %v730_v11 = vpack.c.bf16 %v719_v9, %v718_v10  ;;  %2403 = vmatpush3.bf16.msra.mxu1 %v2884_v53  ;;  %v2899_v10 = vld [vmem:[%s3083_s14 + $0xf0] sm:$0xff]  }
  0xad   : > { %v681_v12 = vpop.permute.xlu1 %680  ;;  %v678_v13 = vpop.permute.xlu0 %677  ;;  %2853 = vset.pattern.permute.xlu1 %v2974_v33  ;;  %2404 = vmatprep.subr.bf16.mxu1 %v2886_v55 }
  0xae   : > { %vm705_vm11 = vcmp.eq.s32.totalorder %v3273_v45, %v681_v12  ;;  %vm704_vm12 = vcmp.eq.s32.totalorder %v3273_v45, %v678_v13  ;;  %2633 = vmatprep.mubr.msk.bf16.mxu1 %vm734_vm4, %v730_v11  ;;  %1077 = vperm.xlu1 %2853, %v3213_v37   ;;  %v2901_v12 = vld [vmem:[%s3083_s14 + $0xb0] sm:$0xff]   ;;  %v2903_v13 = vld [vmem:[%s3083_s14 + $0xf8] sm:$0xff]  }
  0xaf   : > { %v721_v16 = vsel %vm705_vm11, 1.0, %v4030_v7  ;;  %v720_v17 = vsel %vm704_vm12, 1.0, %v4030_v7  ;;  %2471 = vmatpush3.bf16.msra.mxu0 %v2893_v0 }
  0xb0   : > { %v731_v18 = vpack.c.bf16 %v721_v16, %v720_v17  ;;  %2405 = vmatpush3.bf16.msra.mxu1 %v2888_v59  ;;  %2472 = vmatprep.subr.bf16.mxu0 %v2895_v2  ;;  %v2905_v16 = vld [vmem:[%s3083_s14 + $0xb8] sm:$0xff]  }
  0xb1   : > { %v687_v19 = vpop.permute.xlu1 %686  ;;  %v684_v20 = vpop.permute.xlu0 %683  ;;  %2406 = vmatprep.subr.bf16.mxu1 %v2890_v61 }
  0xb2   : > { %vm707_vm13 = vcmp.eq.s32.totalorder %v3273_v45, %v687_v19  ;;  %vm706_vm14 = vcmp.eq.s32.totalorder %v3273_v45, %v684_v20  ;;  %2854 = vset.pattern.permute.xlu1 %v2976_v36 }
  0xb3   : > { %v723_v24 = vsel %vm707_vm13, 1.0, %v4030_v7  ;;  %v722_v25 = vsel %vm706_vm14, 1.0, %v4030_v7  ;;  %2634 = vmatmul.mubr.msk.bf16.gmra.mrb[8].mxu1 %vm734_vm4, %v731_v18  ;;  %1129 = vperm.xlu1 %2854, %v3171_v28  }
  0xb4   : > { %v732_v26 = vpack.c.bf16 %v723_v24, %v722_v25  ;;  %2407 = vmatpush3.bf16.msra.mxu1 %v2892_v63  ;;  %2473 = vmatpush3.bf16.msra.mxu0 %v2897_v5  ;;  %v3443_v25 = vld [vmem:[%s3083_s14 + $0x100] sm:$0xff]  }
  0xb5   : > { %v693_v27 = vpop.permute.xlu1 %692  ;;  %v690_v30 = vpop.permute.xlu0 %689  ;;  %2408 = vmatprep.subr.bf16.mxu1 %v2894_v1  ;;  %2474 = vmatprep.subr.bf16.mxu0 %v2899_v10 }
  0xb6   : > { %vm709_vm0 = vcmp.eq.s32.totalorder %v3273_v45, %v693_v27  ;;  %vm708_vm1 = vcmp.eq.s32.totalorder %v3273_v45, %v690_v30  ;;  %2637 = vmatprep.mubr.msk.bf16.mxu1 %vm734_vm4, %v732_v26 }
  0xb7   : > { %v725_v28 = vsel %vm709_vm0, 1.0, %v4030_v7  ;;  %v724_v31 = vsel %vm708_vm1, 1.0, %v4030_v7  ;;  %2855 = vset.pattern.permute.xlu1 %v2975_v34 }
  0xb8   : > { %v733_v47 = vpack.c.bf16 %v725_v28, %v724_v31  ;;  %993 = vperm.xlu1 %2855, %v3205_v35   ;;  %2409 = vmatpush3.bf16.msra.mxu1 %v2896_v4 }
  0xb9   : > { %v3349_v49 = vpop.permute.xlu1 %863  ;;  %2475 = vmatpush3.bf16.msra.mxu0 %v2901_v12  ;;  %v859_v18 = vpop.permute.xlu0 %858 }
  0xba   : > { %2476 = vmatprep.subr.bf16.mxu0 %v2903_v13 }
  0xbb   : > { %2638 = vmatmul.mubr.msk.bf16.gmra.mrb[12].mxu1 %vm734_vm4, %v733_v47 }
  0xbc   : > { %997 = vperm.xlu1 %2855, %v3213_v37  }
  0xbd   : > { %v3357_v35 = vpop.permute.xlu1 %873  ;;  %2477 = vmatpush3.bf16.msra.mxu0 %v2905_v16  ;;  %v869_v20 = vpop.permute.xlu0 %868 }
  0xbe   : > { %2673 = vmatprep.subr.bf16.mxu0 %v4030_v7 }
  0xc0   : > { %2856 = vset.pattern.permute.xlu1 %v2976_v36 }
  0xc1   : > { %v3363_v56 = vpop.permute.xlu1 %883  ;;  %1141 = vperm.xlu1 %2856, %v3178_v29   ;;  %v3436_v22 = vpop.permute.xlu0 %878 }
  0xc5   : > { %v3367_v58 = vpop.permute.xlu1 %893  ;;  %2857 = vset.pattern.permute.xlu1 %v2974_v33  ;;  %v3440_v24 = vpop.permute.xlu0 %888 }
  0xc6   : > { %1085 = vperm.xlu1 %2857, %v3234_v39  }
  0xc9   : > { %v3375_v29 = vpop.permute.xlu1 %903  ;;  %v3447_v27 = vpop.permute.xlu0 %898 }
  0xca   : > { %2858 = vset.pattern.permute.xlu1 %v2976_v36 }
  0xcb   : > { %1145 = vperm.xlu1 %2858, %v3193_v32  }
  0xce   : > { %v3383_v3 = vpop.permute.xlu1 %1037  ;;  %v1034_v30 = vpop.permute.xlu0 %1033 }
  0xcf   : > { %2859 = vset.pattern.permute.xlu1 %v2975_v34 }
  0xd0   : > { %1001 = vperm.xlu1 %2859, %v3226_v38  }
  0xd2   : > { %v1042_v31 = vpop.permute.xlu0 %1041 }
  0xd3   : > { %v3389_v6 = vpop.permute.xlu1 %953 }
  0xd4   : > { %1005 = vperm.xlu1 %2859, %v3234_v39  }
  0xd7   : > { %v1114_v44 = vpop.permute.xlu0 %1113 }
  0xd8   : > { %2860 = vset.pattern.permute.xlu1 %v2976_v36  ;;  %v3393_v32 = vpop.permute.xlu1 %908 }
  0xd9   : > { %1157 = vperm.xlu1 %2860, %v3213_v37  }
  0xdc   : > { %v3396_v8 = vpop.permute.xlu1 %913  ;;  %v958_v47 = vpop.permute.xlu0 %957 }
  0xdd   : > { %2862 = vset.pattern.permute.xlu1 %v2974_v33 }
  0xde   : > { %1093 = vperm.xlu1 %2862, %v3255_v41  }
  0xe0   : > { %v966_v14 = vpop.permute.xlu0 %965 }
  0xe1   : > { %v3400_v9 = vpop.permute.xlu1 %1045 }
  0xe2   : > { %2863 = vset.pattern.permute.xlu1 %v2976_v36 }
  0xe3   : > { %1161 = vperm.xlu1 %2863, %v3226_v38   ;;  %v2898_v38 = vld [vmem:[%s3083_s14 + $0x70] sm:$0xff]  }
  0xe4   : > { %2410 = vmatprep.subr.bf16.mxu1 %v2898_v38  ;;  %v3454_v51 = vpop.permute.xlu0 %973 }
  0xe6   : > { %v3404_v39 = vpop.permute.xlu1 %961 }
  0xe7   : > { %2864 = vset.pattern.permute.xlu1 %v2975_v34  ;;  %v2900_v34 = vld [vmem:[%s3083_s14 + $0x30] sm:$0xff]  }
  0xe8   : > { %1009 = vperm.xlu1 %2864, %v3247_v40   ;;  %2411 = vmatpush3.bf16.msra.mxu1 %v2900_v34  ;;  %v2902_v40 = vld [vmem:[%s3083_s14 + $0x78] sm:$0xff]   ;;  %v3458_v53 = vpop.permute.xlu0 %981 }
  0xe9   : > { %2412 = vmatprep.subr.bf16.mxu1 %v2902_v40 }
  0xeb   : > { %v3408_v37 = vpop.permute.xlu1 %918 }
  0xec   : > { %4036 = vst [vmem:[#allocation9_spill] sm:$0xff] %v3408_v37  ;;  %1013 = vperm.xlu1 %2864, %v3255_v41   ;;  %2413 = vmatpush3.bf16.msra.mxu1 %v2904_v15  ;;  %v3462_v55 = vpop.permute.xlu0 %989 }
  0xed   : > { %2641 = vmatprep.subr.bf16.mxu1 %v3443_v25 }
  0xef   : > { %v3412_v33 = vpop.permute.xlu1 %923 }
  0xf0   : > { %2865 = vset.pattern.permute.xlu1 %v2976_v36  ;;  %4037 = vst [vmem:[#allocation10_spill] sm:$0xff] %v3412_v33 }
  0xf1   : > { %1173 = vperm.xlu1 %2865, %v3255_v41   ;;  %v1050_v59 = vpop.permute.xlu0 %1049 }
  0xf4   : > { %v3417_v11 = vpop.permute.xlu1 %1053 }
  0xf5   : > { %v1058_v61 = vpop.permute.xlu0 %1057 }
  0xf9   : > { %v3425_v36 = vpop.permute.xlu1 %969  ;;  %v3470_v63 = vpop.permute.xlu0 %1073 }
  0xfd   : > { %v3474_v1 = vpop.permute.xlu0 %1081 }
  0xfe   : > { %v3428_v41 = vpop.permute.xlu1 %928  ;;  %4041 = vst [vmem:[#allocation14_spill] sm:$0xff] %v3474_v1 }
  0xff   : > { %4038 = vst [vmem:[#allocation11_spill] sm:$0xff] %v3428_v41 }
 0x101   : > { %v3478_v4 = vpop.permute.xlu0 %1089 }
 0x102   : > { %v3430_v17 = vpop.permute.xlu1 %933  ;;  %4043 = vst [vmem:[#allocation16_spill] sm:$0xff] %v3478_v4 }
 0x103   : > { %4039 = vst [vmem:[#allocation12_spill] sm:$0xff] %v3430_v17 }
 0x106   : > { %v3482_v38 = vpop.permute.xlu0 %1133 }
 0x107   : > { %v3432_v19 = vpop.permute.xlu1 %1061 }
 0x10a   : > { %v3505_v17 = vpop.permute.xlu0 %1137 }
 0x10c   : > { %v3434_v21 = vpop.permute.xlu1 %977 }
 0x111   : > { %v3438_v23 = vpop.permute.xlu1 %1065 }
 0x115   : > { %v3445_v26 = vpop.permute.xlu1 %1069 }
 0x11a   : > { %v1118_v28 = vpop.permute.xlu1 %1117 }
 0x11f   : > { %v3450_v42 = vpop.permute.xlu1 %985 }
 0x124   : > { %v1122_v46 = vpop.permute.xlu1 %1121 }
 0x128   : > { %v1126_v48 = vpop.permute.xlu1 %1125 }
 0x12d   : > { %v3452_v50 = vpop.permute.xlu1 %1077 }
 0x132   : > { %v3456_v52 = vpop.permute.xlu1 %1129 }
 0x137   : > { %v3460_v54 = vpop.permute.xlu1 %993 }
 0x13b   : > { %v3464_v57 = vpop.permute.xlu1 %997 }
 0x140   : > { %v3466_v60 = vpop.permute.xlu1 %1141 }
 0x145   : > { %v3468_v62 = vpop.permute.xlu1 %1085 }
 0x146   : > { %4040 = vst [vmem:[#allocation13_spill] sm:$0xff] %v3468_v62 }
 0x14a   : > { %v3472_v0 = vpop.permute.xlu1 %1145 }
 0x14f   : > { %v3476_v2 = vpop.permute.xlu1 %1001 }
 0x150   : > { %4042 = vst [vmem:[#allocation15_spill] sm:$0xff] %v3476_v2 }
 0x153   : > { %v3480_v5 = vpop.permute.xlu1 %1005 }
 0x154   : > { %4044 = vst [vmem:[#allocation17_spill] sm:$0xff] %v3480_v5 }
 0x158   : > { %v3484_v10 = vpop.permute.xlu1 %1157 }
 0x176   : > { %v3486_v34 = vpop.f32.mrb[0].mxu1 }
 0x177   : > { %v3489_v12 = vmul.f32 %v3486_v34, %v1122_v46  ;;  %v793_v40 = vpop.f32.mrb[1].mxu1  ;;  %v938_v13 = vmul.f32 %v3486_v34, %v869_v20  ;;  %v1098_v15 = vmul.f32 %v3486_v34, %v1042_v31  ;;  %v3495_v16 = vmul.f32 %v3486_v34, %v3404_v39 }
 0x178   : > { %v1016_v43 = vmul.f32 %v3389_v6, %v793_v40  ;;  %v3498_v7 = vpop.f32.mrb[2].mxu1  ;;  %v936_v45 = vmul.f32 %v859_v18, %v793_v40  ;;  %v1096_v5 = vmul.f32 %v1034_v30, %v793_v40  ;;  %v3500_v62 = vmul.f32 %v1114_v44, %v793_v40 }
 0x179   : > { %v3503_v46 = vmul.f32 %v3498_v7, %v1126_v48  ;;  %v796_v33 = vpop.f32.mrb[3].mxu1  ;;  %v939_v20 = vmul.f32 %v3498_v7, %v3357_v35  ;;  %v1099_v39 = vmul.f32 %v3498_v7, %v3400_v9  ;;  %v3515_v48 = vpop.permute.xlu1 %1093  ;;  %v1019_v37 = vmul.f32 %v3498_v7, %v966_v14 }
 0x17a   : > { %v1017_v31 = vmul.f32 %v958_v47, %v796_v33  ;;  %v1192_v18 = vpack.c.bf16 %v796_v33, %v793_v40  ;;  %v937_v30 = vmul.f32 %v3349_v49, %v796_v33  ;;  %v1097_v44 = vmul.f32 %v3383_v3, %v796_v33  ;;  %v2907_v49 = vld [vmem:[%s3083_s14 + $0x108] sm:$0xff]   ;;  %v3530_v14 = vpop.permute.xlu0 %1149 }
 0x17b   : > { %v1198_v1 = vpack.c.bf16 %v939_v20, %v938_v13  ;;  %v1200_v35 = vpack.c.bf16 %v1099_v39, %v1098_v15  ;;  %v3520_v6 = vmul.f32 %v1118_v28, %v796_v33  ;;  %v1199_v47 = vpack.c.bf16 %v1019_v37, %v3495_v16  ;;  %v2908_v13 = vld [vmem:[%s3083_s14 + $0x110] sm:$0xff]  }
 0x17c   : > { %v1193_v9 = vpack.c.bf16 %v937_v30, %v936_v45  ;;  %v1195_v4 = vpack.c.bf16 %v1097_v44, %v1096_v5  ;;  %v1194_v41 = vpack.c.bf16 %v1017_v31, %v1016_v43  ;;  %v2909_v30 = vld [vmem:[%s3083_s14 + $0x118] sm:$0xff]  }
 0x17d   : > { %v3545_v28 = vpop.permute.xlu1 %1161 }
 0x17e   : > { %v3523_v40 = vpop.f32.mrb[4].mxu1  ;;  %1584 = vmatprep.mubr.bf16.mxu1 %v1193_v9  ;;  %1681 = vmatprep.mubr.bf16.mxu0 %v1195_v4  ;;  %v1154_v39 = vpop.permute.xlu0 %1153 }
 0x17f   : > { %v3528_v2 = vpop.f32.mrb[5].mxu1  ;;  %1585 = vmatmul.mubr.bf16.vlgmr.msra.gmra.mrb[16].mxu1 %v1192_v18  ;;  %1682 = vmatmul.mubr.bf16.vlgmr.msra.gmra.mrb[4].mxu0 %v1194_v41  ;;  %v3534_v43 = vmul.f32 %v3523_v40, %v3440_v24  ;;  %v3537_v45 = vmul.f32 %v3523_v40, %v1058_v61  ;;  %v3541_v37 = vmul.f32 %v3523_v40, %v3434_v21 }
 0x180   : > { %v3543_v33 = vpop.f32.mrb[6].mxu1  ;;  %1592 = vmatprep.mubr.bf16.mxu1 %v1198_v1  ;;  %1689 = vmatprep.mubr.bf16.mxu0 %v1200_v35  ;;  %v940_v41 = vmul.f32 %v3436_v22, %v3528_v2  ;;  %v1100_v24 = vmul.f32 %v1050_v59, %v3528_v2  ;;  %v3552_v61 = vmul.f32 %v3425_v36, %v3528_v2 }
 0x181   : > { %v3554_v4 = vpop.f32.mrb[7].mxu1  ;;  %v3558_v21 = vmul.f32 %v3543_v33, %v3367_v58  ;;  %v3562_v1 = vmul.f32 %v3543_v33, %v3432_v19  ;;  %v3568_v22 = vmul.f32 %v3543_v33, %v3458_v53  ;;  %2642 = vmatpush3.bf16.msra.mxu1 %v3443_v25  ;;  %v1010_v18 = vpop.permute.xlu1 %1009  ;;  %v3609_v44 = vmul.f32 %v3543_v33, %v3466_v60 }
 0x182   : > { %v941_v36 = vmul.f32 %v3363_v56, %v3554_v4  ;;  %v1101_v58 = vmul.f32 %v3417_v11, %v3554_v4  ;;  %v1202_v59 = vpack.c.bf16 %v3554_v4, %v3528_v2  ;;  %v3579_v19 = vmul.f32 %v3454_v51, %v3554_v4  ;;  %2643 = vmatprep.subr.bf16.mxu1 %v2907_v49 }
 0x183   : > { %v1208_v53 = vpack.c.bf16 %v3558_v21, %v3534_v43  ;;  %v1210_v25 = vpack.c.bf16 %v3562_v1, %v3537_v45  ;;  %v3590_v11 = vmul.f32 %v3456_v52, %v3528_v2  ;;  %v3596_v20 = vmul.f32 %v3482_v38, %v3554_v4  ;;  %v1166_v4 = vpop.permute.xlu0 %1165  ;;  %v4053_v45 = vld [vmem:[#allocation10_spill] sm:$0xff] }
 0x184   : > { %v1203_v15 = vpack.c.bf16 %v941_v36, %v940_v41  ;;  %v1205_v16 = vpack.c.bf16 %v1101_v58, %v1100_v24  ;;  %v1204_v51 = vpack.c.bf16 %v3579_v19, %v3552_v61  ;;  %v3605_v2 = vmul.f32 %v3523_v40, %v3505_v17 }
 0x185   : > { %2644 = vmatpush3.bf16.msra.mxu1 %v2907_v49  ;;  %v4046_v35 = vpack.c.bf16 %v3498_v7, %v3486_v34  ;;  %v1014_v36 = vpop.permute.xlu1 %1013 }
 0x186   : > { %v3598_v31 = vpop.f32.mrb[8].mxu1  ;;  %2645 = vmatprep.subr.bf16.mxu1 %v2908_v13  ;;  %4045 = vst [vmem:[#allocation18_spill] sm:$0xff] %v3605_v2 }
 0x187   : > { %v3611_v38 = vpop.f32.mrb[9].mxu1  ;;  %1593 = vmatmul.mubr.bf16.gmra.mrb[20].mxu1 %v4046_v35  ;;  %1690 = vmatmul.mubr.bf16.gmra.mrb[8].mxu0 %v1199_v47  ;;  %v3618_v9 = vmul.f32 %v3598_v31, %v3393_v32  ;;  %v3622_v49 = vmul.f32 %v3598_v31, %v3470_v63  ;;  %v3626_v17 = vmul.f32 %v3598_v31, %v3460_v54 }
 0x188   : > { %v3628_v60 = vpop.f32.mrb[10].mxu1  ;;  %1600 = vmatprep.mubr.bf16.mxu1 %v1203_v15  ;;  %1697 = vmatprep.mubr.bf16.mxu0 %v1205_v16  ;;  %v3632_v7 = vmul.f32 %v3447_v27, %v3611_v38  ;;  %v3636_v32 = vmul.f32 %v3438_v23, %v3611_v38  ;;  %v3640_v63 = vmul.f32 %v3450_v42, %v3611_v38  ;;  %v2911_v15 = vld [vmem:[%s3083_s14 + $0x128] sm:$0xff]  }
 0x189   : > { %v3642_v34 = vpop.f32.mrb[11].mxu1  ;;  %v3646_v54 = vmul.f32 %v3628_v60, %v3396_v8  ;;  %v3650_v47 = vmul.f32 %v3628_v60, %v3452_v50  ;;  %v3656_v23 = vmul.f32 %v3628_v60, %v3464_v57  ;;  %2646 = vmatpush3.bf16.msra.mxu1 %v2908_v13  ;;  %v2910_v57 = vld [vmem:[%s3083_s14 + $0x120] sm:$0xff]   ;;  %v3692_v16 = vmul.f32 %v3472_v0, %v3611_v38 }
 0x18a   : > { %v3660_v42 = vmul.f32 %v3375_v29, %v3642_v34  ;;  %v3664_v8 = vmul.f32 %v3445_v26, %v3642_v34  ;;  %v3670_v41 = vmul.f32 %v3462_v55, %v3642_v34  ;;  %2647 = vmatprep.subr.bf16.mxu1 %v2909_v30  ;;  %v3696_v35 = vmul.f32 %v3530_v14, %v3642_v34  ;;  %v1174_v26 = vpop.permute.xlu1 %1173  ;;  %v4055_v29 = vld [vmem:[#allocation17_spill] sm:$0xff] }
 0x18c   : > { %v1213_v55 = vpack.c.bf16 %v3660_v42, %v3632_v7  ;;  %v1215_v58 = vpack.c.bf16 %v3664_v8, %v3636_v32  ;;  %v1214_v19 = vpack.c.bf16 %v3670_v41, %v3640_v63  ;;  %v3699_v7 = vmul.f32 %v3598_v31, %v1154_v39  ;;  %v4047_v63 = vld [vmem:[#allocation11_spill] sm:$0xff]  ;;  %v4048_v8 = vld [vmem:[#allocation16_spill] sm:$0xff] }
 0x18d   : > { %2648 = vmatpush3.bf16.msra.mxu1 %v2909_v30  ;;  %v3703_v32 = vmul.f32 %v3628_v60, %v3484_v10  ;;  %v4049_v10 = vld [vmem:[#allocation9_spill] sm:$0xff] }
 0x18e   : > { %v3687_v13 = vpop.f32.mrb[12].mxu1  ;;  %2649 = vmatprep.subr.bf16.mxu1 %v2910_v57 }
 0x18f   : > { %v841_v30 = vpop.f32.mrb[13].mxu1  ;;  %1601 = vmatmul.mubr.bf16.gmra.mrb[24].mxu1 %v1202_v59  ;;  %1698 = vmatmul.mubr.bf16.gmra.mrb[12].mxu0 %v1204_v51  ;;  %v950_v42 = vmul.f32 %v3687_v13, %v4047_v63  ;;  %v1110_v0 = vmul.f32 %v3687_v13, %v4048_v8  ;;  %v1030_v41 = vmul.f32 %v3687_v13, %v1010_v18  ;;  %v4050_v51 = vld [vmem:[#allocation14_spill] sm:$0xff]  ;;  %v4051_v63 = vld [vmem:[#allocation15_spill] sm:$0xff]  ;;  %v4052_v8 = vld [vmem:[#allocation12_spill] sm:$0xff] }
 0x190   : > { %v2640_v14 = vpop.f32.mrb[14].mxu1  ;;  %1608 = vmatprep.mubr.bf16.mxu1 %v1208_v53  ;;  %1705 = vmatprep.mubr.bf16.mxu0 %v1210_v25  ;;  %v948_v59 = vmul.f32 %v4049_v10, %v841_v30  ;;  %v1108_v39 = vmul.f32 %v4050_v51, %v841_v30  ;;  %v1028_v61 = vmul.f32 %v4051_v63, %v841_v30  ;;  %v1170_v53 = vpop.permute.xlu0 %1169  ;;  %v4054_v25 = vld [vmem:[#allocation13_spill] sm:$0xff]  ;;  %v2912_v63 = vld [vmem:[%s3083_s14 + $0x130] sm:$0xff]  }
 0x191   : > { %v844_v52 = vpop.f32.mrb[15].mxu1  ;;  %v951_v3 = vmul.f32 %v2640_v14, %v4052_v8  ;;  %v1111_v18 = vmul.f32 %v2640_v14, %v3515_v48  ;;  %2650 = vmatpush3.bf16.msra.mxu1 %v2910_v57  ;;  %v1227_v43 = vpack.c.bf16 %v2640_v14, %v3687_v13  ;;  %v1031_v21 = vmul.f32 %v2640_v14, %v1014_v36 }
 0x192   : > { %v949_v1 = vmul.f32 %v4053_v45, %v844_v52  ;;  %v1109_v10 = vmul.f32 %v4054_v25, %v844_v52  ;;  %v1222_v27 = vpack.c.bf16 %v844_v52, %v841_v30  ;;  %v1029_v51 = vmul.f32 %v4055_v29, %v844_v52  ;;  %2651 = vmatprep.subr.bf16.mxu1 %v2911_v15 }
 0x193   : > { %v1228_v24 = vpack.c.bf16 %v951_v3, %v950_v42  ;;  %v1230_v8 = vpack.c.bf16 %v1111_v18, %v1110_v0  ;;  %v1229_v50 = vpack.c.bf16 %v1031_v21, %v1030_v41  ;;  %v1216_v48 = vpack.c.bf16 %v3696_v35, %v3692_v16  ;;  %v2913_v3 = vld [vmem:[%s3083_s14 + $0x138] sm:$0xff]  }
 0x194   : > { %v1223_v57 = vpack.c.bf16 %v949_v1, %v948_v59  ;;  %v1225_v36 = vpack.c.bf16 %v1109_v10, %v1108_v39  ;;  %v1224_v56 = vpack.c.bf16 %v1029_v51, %v1028_v61  ;;  %v1221_v45 = vpack.c.bf16 %v3703_v32, %v3699_v7 }
 0x195   : > { %2652 = vmatpush3.bf16.msra.mxu1 %v2911_v15  ;;  %v1188_v25 = vmul.f32 %v3545_v28, %v841_v30  ;;  %v1189_v5 = vmul.f32 %v1166_v4, %v844_v52  ;;  %v1190_v29 = vmul.f32 %v3687_v13, %v1170_v53  ;;  %v1191_v2 = vmul.f32 %v2640_v14, %v1174_v26 }
 0x196   : > { %2653 = vmatprep.subr.bf16.mxu1 %v2912_v63  ;;  %v4056_v42 = vpack.c.bf16 %v3543_v33, %v3523_v40  ;;  %v4057_v16 = vpack.c.bf16 %v3568_v22, %v3541_v37  ;;  %v4058_v28 = vpack.c.bf16 %v3642_v34, %v3611_v38  ;;  %v4059_v40 = vpack.c.bf16 %v3646_v54, %v3618_v9 }
 0x197   : > { %v1226_v61 = vpack.c.bf16 %v1189_v5, %v1188_v25  ;;  %v1231_v35 = vpack.c.bf16 %v1191_v2, %v1190_v29  ;;  %v4060_v37 = vpack.c.bf16 %v3650_v47, %v3622_v49  ;;  %v4061_v33 = vpack.c.bf16 %v3628_v60, %v3598_v31 }
 0x198   : > { %1609 = vmatmul.mubr.bf16.gmra.mrb[28].mxu1 %v4056_v42  ;;  %1706 = vmatmul.mubr.bf16.gmra.mrb[16].mxu0 %v4057_v16  ;;  %v4062_v5 = vpack.c.bf16 %v3656_v23, %v3626_v17  ;;  %v4063_v22 = vpack.c.bf16 %v3520_v6, %v3500_v62  ;;  %v4064_v52 = vmov 0.0   ;;  %v4065_v31 = vpack.c.bf16 %v3503_v46, %v3489_v12 }
 0x199   : > { %1616 = vmatprep.mubr.bf16.mxu1 %v1213_v55  ;;  %1713 = vmatprep.mubr.bf16.mxu0 %v1215_v58  ;;  %v4066_v2 = vpack.c.bf16 %v3596_v20, %v3590_v11 }
 0x19a   : > { %2654 = vmatpush3.bf16.msra.mxu1 %v2912_v63 }
 0x19b   : > { %2655 = vmatprep.subr.bf16.mxu1 %v2913_v3 }
 0x19e   : > { %2656 = vmatpush3.bf16.msra.mxu1 %v2913_v3 }
 0x1a0   : > { %1617 = vmatmul.mubr.bf16.gmra.mrb[32].mxu1 %v4058_v28  ;;  %1714 = vmatmul.mubr.bf16.gmra.mrb[20].mxu0 %v1214_v19 }
 0x1a1   : > { %1624 = vmatprep.mubr.bf16.mxu1 %v4059_v40  ;;  %1721 = vmatprep.mubr.bf16.mxu0 %v4060_v37 }
 0x1a8   : > { %1625 = vmatmul.mubr.bf16.gmra.mrb[36].mxu1 %v4061_v33  ;;  %1722 = vmatmul.mubr.bf16.gmra.mrb[24].mxu0 %v4062_v5 }
 0x1a9   : > { %1632 = vmatprep.mubr.bf16.mxu1 %v1223_v57  ;;  %1729 = vmatprep.mubr.bf16.mxu0 %v1225_v36 }
 0x1b0   : > { %1633 = vmatmul.mubr.bf16.gmra.mrb[40].mxu1 %v1222_v27  ;;  %1730 = vmatmul.mubr.bf16.gmra.mrb[28].mxu0 %v1224_v56  ;;  %v4067_v56 = vld [vmem:[#allocation18_spill] sm:$0xff] }
 0x1b1   : > { %1640 = vmatprep.mubr.bf16.mxu1 %v1228_v24  ;;  %1737 = vmatprep.mubr.bf16.mxu0 %v1230_v8  ;;  %v4068_v38 = vpack.c.bf16 %v3609_v44, %v4067_v56 }
 0x1b8   : > { %1641 = vmatmul.mubr.bf16.gmra.mrb[44].mxu1 %v1227_v43  ;;  %1738 = vmatmul.mubr.bf16.gmra.mrb[32].mxu0 %v1229_v50 }
 0x1b9   : > { %2657 = vmatprep.mubr.bf16.mxu1 %v4063_v22  ;;  %2689 = vmatprep.mubr.msk.bf16.mxu0 %vm2977_vm15, %v4064_v52 }
 0x1c0   : > { %2658 = vmatmul.mubr.bf16.vlgmr.msra.gmra.mrb[48].mxu1 %v4065_v31 }
 0x1c1   : > { %2661 = vmatprep.mubr.bf16.mxu1 %v4066_v2 }
 0x1c8   : > { %2662 = vmatmul.mubr.bf16.gmra.mrb[52].mxu1 %v4068_v38 }
 0x1c9   : > { %2665 = vmatprep.mubr.bf16.mxu1 %v1216_v48 }
 0x1d0   : > { %2666 = vmatmul.mubr.bf16.gmra.mrb[56].mxu1 %v1221_v45 }
 0x1d1   : > { %2669 = vmatprep.mubr.bf16.mxu1 %v1226_v61 }
 0x1d8   : > { %2670 = vmatmul.mubr.bf16.gmra.mrb[60].mxu1 %v1231_v35 }
 0x252   : > { %v2414_v62 = vpop.f32.mrb[16].mxu1  ;;  %v2478_v6 = vpop.f32.mrb[4].mxu0 }
 0x253   : > { %v2415_v9 = vpop.f32.mrb[17].mxu1  ;;  %v2479_v49 = vpop.f32.mrb[5].mxu0 }
 0x254   : > { %v2416_v17 = vadd.f32 %v2415_v9, %v2414_v62  ;;  %v2480_v60 = vadd.f32 %v2479_v49, %v2478_v6  ;;  %v2417_v12 = vpop.f32.mrb[18].mxu1  ;;  %v2481_v46 = vpop.f32.mrb[6].mxu0 }
 0x255   : > { %v2418_v34 = vpop.f32.mrb[19].mxu1  ;;  %v2482_v54 = vpop.f32.mrb[7].mxu0 }
 0x256   : > { %v2419_v11 = vadd.f32 %v2418_v34, %v2417_v12  ;;  %v2483_v20 = vadd.f32 %v2482_v54, %v2481_v46  ;;  %v3768_v47 = vadd.f32 %v2480_v60, %v2416_v17 }
 0x258   : > { %v3770_v44 = vadd.f32 %v2483_v20, %v2419_v11 }
 0x25a   : > { %v2420_v27 = vpop.f32.mrb[20].mxu1  ;;  %v2484_v23 = vpop.f32.mrb[8].mxu0 }
 0x25b   : > { %v2421_v50 = vpop.f32.mrb[21].mxu1  ;;  %v2485_v24 = vpop.f32.mrb[9].mxu0 }
 0x25c   : > { %v2422_v26 = vadd.f32 %v2421_v50, %v2420_v27  ;;  %v2486_v4 = vadd.f32 %v2485_v24, %v2484_v23  ;;  %v2423_v55 = vpop.f32.mrb[22].mxu1  ;;  %v2487_v58 = vpop.f32.mrb[10].mxu0 }
 0x25d   : > { %v2424_v19 = vpop.f32.mrb[23].mxu1  ;;  %v2488_v13 = vpop.f32.mrb[11].mxu0 }
 0x25e   : > { %v2425_v15 = vadd.f32 %v2424_v19, %v2423_v55  ;;  %v2489_v7 = vadd.f32 %v2488_v13, %v2487_v58  ;;  %v3772_v32 = vadd.f32 %v2486_v4, %v2422_v26 }
 0x260   : > { %v3774_v30 = vadd.f32 %v2489_v7, %v2425_v15 }
 0x262   : > { %v2426_v0 = vpop.f32.mrb[24].mxu1  ;;  %v2490_v41 = vpop.f32.mrb[12].mxu0 }
 0x263   : > { %v2427_v14 = vpop.f32.mrb[25].mxu1  ;;  %v2491_v59 = vpop.f32.mrb[13].mxu0 }
 0x264   : > { %v2428_v39 = vadd.f32 %v2427_v14, %v2426_v0  ;;  %v2492_v18 = vadd.f32 %v2491_v59, %v2490_v41  ;;  %v2429_v43 = vpop.f32.mrb[26].mxu1  ;;  %v2493_v21 = vpop.f32.mrb[14].mxu0 }
 0x265   : > { %v2430_v53 = vpop.f32.mrb[27].mxu1  ;;  %v2494_v1 = vpop.f32.mrb[15].mxu0 }
 0x266   : > { %v2431_v10 = vadd.f32 %v2430_v53, %v2429_v43  ;;  %v2495_v51 = vadd.f32 %v2494_v1, %v2493_v21  ;;  %v3776_v63 = vadd.f32 %v2492_v18, %v2428_v39 }
 0x268   : > { %v3778_v8 = vadd.f32 %v2495_v51, %v2431_v10 }
 0x26b   : > { %v2432_v48 = vpop.f32.mrb[28].mxu1  ;;  %v2496_v57 = vpop.f32.mrb[16].mxu0 }
 0x26c   : > { %v2433_v36 = vpop.f32.mrb[29].mxu1  ;;  %v2497_v45 = vpop.f32.mrb[17].mxu0 }
 0x26d   : > { %v2434_v25 = vadd.f32 %v2433_v36, %v2432_v48  ;;  %v2498_v29 = vadd.f32 %v2497_v45, %v2496_v57  ;;  %v2435_v3 = vpop.f32.mrb[30].mxu1  ;;  %v2499_v42 = vpop.f32.mrb[18].mxu0 }
 0x26e   : > { %v2436_v16 = vpop.f32.mrb[31].mxu1  ;;  %v2500_v61 = vpop.f32.mrb[19].mxu0 }
 0x26f   : > { %v2437_v35 = vadd.f32 %v2436_v16, %v2435_v3  ;;  %v2501_v28 = vadd.f32 %v2500_v61, %v2499_v42  ;;  %v3780_v40 = vadd.f32 %v2498_v29, %v2434_v25 }
 0x271   : > { %v3782_v37 = vadd.f32 %v2501_v28, %v2437_v35 }
 0x273   : > { %v2438_v33 = vpop.f32.mrb[32].mxu1  ;;  %v2502_v5 = vpop.f32.mrb[20].mxu0 }
 0x274   : > { %v2439_v22 = vpop.f32.mrb[33].mxu1  ;;  %v2503_v31 = vpop.f32.mrb[21].mxu0 }
 0x275   : > { %v2440_v2 = vadd.f32 %v2439_v22, %v2438_v33  ;;  %v2504_v56 = vadd.f32 %v2503_v31, %v2502_v5  ;;  %v2441_v38 = vpop.f32.mrb[34].mxu1  ;;  %v2505_v62 = vpop.f32.mrb[22].mxu0 }
 0x276   : > { %v2442_v6 = vpop.f32.mrb[35].mxu1  ;;  %v2506_v9 = vpop.f32.mrb[23].mxu0 }
 0x277   : > { %v2443_v49 = vadd.f32 %v2442_v6, %v2441_v38  ;;  %v2507_v17 = vadd.f32 %v2506_v9, %v2505_v62  ;;  %v3784_v60 = vadd.f32 %v2504_v56, %v2440_v2 }
 0x279   : > { %v3786_v12 = vadd.f32 %v2507_v17, %v2443_v49 }
 0x27b   : > { %v2444_v46 = vpop.f32.mrb[36].mxu1  ;;  %v2508_v34 = vpop.f32.mrb[24].mxu0 }
 0x27c   : > { %v2445_v54 = vpop.f32.mrb[37].mxu1  ;;  %v2509_v11 = vpop.f32.mrb[25].mxu0 }
 0x27d   : > { %v2446_v20 = vadd.f32 %v2445_v54, %v2444_v46  ;;  %v2510_v27 = vadd.f32 %v2509_v11, %v2508_v34  ;;  %v2447_v23 = vpop.f32.mrb[38].mxu1  ;;  %v2511_v50 = vpop.f32.mrb[26].mxu0 }
 0x27e   : > { %v2448_v24 = vpop.f32.mrb[39].mxu1  ;;  %v2512_v26 = vpop.f32.mrb[27].mxu0 }
 0x27f   : > { %v2449_v4 = vadd.f32 %v2448_v24, %v2447_v23  ;;  %v2513_v55 = vadd.f32 %v2512_v26, %v2511_v50  ;;  %v1724_v58 = vadd.f32 %v2510_v27, %v2446_v20 }
 0x281   : > { %v1727_v19 = vadd.f32 %v2513_v55, %v2449_v4 }
 0x283   : > { %v2450_v13 = vpop.f32.mrb[40].mxu1  ;;  %v2514_v15 = vpop.f32.mrb[28].mxu0 }
 0x284   : > { %v2451_v7 = vpop.f32.mrb[41].mxu1  ;;  %v2515_v0 = vpop.f32.mrb[29].mxu0 }
 0x285   : > { %v2452_v41 = vadd.f32 %v2451_v7, %v2450_v13  ;;  %v2516_v14 = vadd.f32 %v2515_v0, %v2514_v15  ;;  %v2453_v59 = vpop.f32.mrb[42].mxu1  ;;  %v2517_v39 = vpop.f32.mrb[30].mxu0 }
 0x286   : > { %v2454_v18 = vpop.f32.mrb[43].mxu1  ;;  %v2518_v43 = vpop.f32.mrb[31].mxu0 }
 0x287   : > { %v2455_v21 = vadd.f32 %v2454_v18, %v2453_v59  ;;  %v2519_v53 = vadd.f32 %v2518_v43, %v2517_v39  ;;  %v1732_v1 = vadd.f32 %v2516_v14, %v2452_v41  ;;  %v2367_v18 = vld [vmem:[%s4019_s2] ss:$0 sm:$0xff]  ;;  %v2978_v43 = vmov 1.0|1.0  }
 0x289   : > { %v3788_v10 = vadd.f32 %v2519_v53, %v2455_v21  ;;  %v2310_v21 = vld [vmem:[%s476_s30] ss:$0 sm:$0xff] }
 0x28b   : > { %v2456_v51 = vpop.f32.mrb[44].mxu1  ;;  %v2520_v48 = vpop.f32.mrb[32].mxu0 }
 0x28c   : > { %v2457_v57 = vpop.f32.mrb[45].mxu1  ;;  %v2521_v36 = vpop.f32.mrb[33].mxu0 }
 0x28d   : > { %v2458_v45 = vadd.f32 %v2457_v57, %v2456_v51  ;;  %v2522_v25 = vadd.f32 %v2521_v36, %v2520_v48  ;;  %v2459_v29 = vpop.f32.mrb[46].mxu1  ;;  %v2523_v3 = vpop.f32.mrb[34].mxu0 }
 0x28e   : > { %v2460_v42 = vpop.f32.mrb[47].mxu1  ;;  %v2524_v16 = vpop.f32.mrb[35].mxu0 }
 0x28f   : > { %v2461_v61 = vadd.f32 %v2460_v42, %v2459_v29  ;;  %v2525_v35 = vadd.f32 %v2524_v16, %v2523_v3  ;;  %v1740_v28 = vadd.f32 %v2522_v25, %v2458_v45 }
 0x291   : > { %v1743_v33 = vadd.f32 %v2525_v35, %v2461_v61 }
 0x293   : > { %v2659_v5 = vpop.f32.mrb[48].mxu1 }
 0x294   : > { %v1789_v22 = vadd.f32 %v2659_v5, %v3772_v32  ;;  %v1780_v31 = vpop.f32.mrb[49].mxu1 }
 0x295   : > { %v1781_v2 = vadd.f32 %v1780_v31, %v3768_v47  ;;  %v2660_v56 = vpop.f32.mrb[50].mxu1 }
 0x296   : > { %v1792_v38 = vadd.f32 %v2660_v56, %v3774_v30  ;;  %v1783_v62 = vpop.f32.mrb[51].mxu1 }
 0x297   : > { %v1784_v6 = vadd.f32 %v1783_v62, %v3770_v44 }
 0x298   : > { %v1858_v9 = vpack.c.bf16 %v1792_v38, %v1789_v22 }
 0x299   : > { %v1857_v49 = vpack.c.bf16 %v1784_v6, %v1781_v2 }
 0x29b   : > { %v2663_v17 = vpop.f32.mrb[52].mxu1  ;;  %2674 = vmatpush3.bf16.msra.mxu0 %v1857_v49 }
 0x29c   : > { %v1805_v46 = vadd.f32 %v2663_v17, %v3780_v40  ;;  %v1796_v34 = vpop.f32.mrb[53].mxu1  ;;  %2675 = vmatprep.subr.bf16.mxu0 %v4064_v52 }
 0x29d   : > { %v1797_v32 = vadd.f32 %v1796_v34, %v3776_v63  ;;  %v2664_v54 = vpop.f32.mrb[54].mxu1 }
 0x29e   : > { %v1808_v47 = vadd.f32 %v2664_v54, %v3782_v37  ;;  %v1799_v11 = vpop.f32.mrb[55].mxu1 }
 0x29f   : > { %v1800_v30 = vadd.f32 %v1799_v11, %v3778_v8  ;;  %2676 = vmatpush3.bf16.msra.mxu0 %v1858_v9 }
 0x2a0   : > { %v1860_v20 = vpack.c.bf16 %v1808_v47, %v1805_v46  ;;  %2677 = vmatprep.subr.bf16.mxu0 %v4064_v52 }
 0x2a1   : > { %v1859_v44 = vpack.c.bf16 %v1800_v30, %v1797_v32 }
 0x2a3   : > { %v2667_v27 = vpop.f32.mrb[56].mxu1  ;;  %2678 = vmatpush3.bf16.msra.mxu0 %v1859_v44 }
 0x2a4   : > { %v1821_v23 = vadd.f32 %v2667_v27, %v1724_v58  ;;  %v1812_v40 = vpop.f32.mrb[57].mxu1  ;;  %2679 = vmatprep.subr.bf16.mxu0 %v4064_v52  ;;  %v4069_v58 = vlaneseq }
 0x2a5   : > { %v1813_v50 = vadd.f32 %v1812_v40, %v3784_v60  ;;  %v2668_v63 = vpop.f32.mrb[58].mxu1 }
 0x2a6   : > { %v1824_v24 = vadd.f32 %v2668_v63, %v1727_v19  ;;  %v1815_v26 = vpop.f32.mrb[59].mxu1  ;;  %v1844_v7 = vshrl.u32 %v4069_v58, 7 }
 0x2a7   : > { %v1816_v37 = vadd.f32 %v1815_v26, %v3786_v12  ;;  %2680 = vmatpush3.bf16.msra.mxu0 %v1860_v20 }
 0x2a8   : > { %v1862_v8 = vpack.c.bf16 %v1824_v24, %v1821_v23  ;;  %2681 = vmatprep.subr.bf16.mxu0 %v4064_v52  ;;  %v1845_v59 = vadd.s32 8, %v1844_v7  ;;  %vm1850_vm2 = vcmp.eq.s32.totalorder %v1844_v7, %v2367_v18 }
 0x2a9   : > { %v1861_v4 = vpack.c.bf16 %v1816_v37, %v1813_v50 }
 0x2aa   : > { %vm1851_vm3 = vcmp.eq.s32.totalorder %v1845_v59, %v2367_v18 }
 0x2ab   : > { %v2671_v55 = vpop.f32.mrb[60].mxu1  ;;  %2682 = vmatpush3.bf16.msra.mxu0 %v1861_v4  ;;  %vm2368_vm4 = vmpackc.low %vm1851_vm3, %vm1850_vm2 }
 0x2ac   : > { %v1837_v13 = vadd.f32 %v2671_v55, %v1740_v28  ;;  %v1828_v15 = vpop.f32.mrb[61].mxu1  ;;  %2683 = vmatprep.subr.bf16.mxu0 %v4064_v52 }
 0x2ad   : > { %v1829_v0 = vadd.f32 %v1828_v15, %v1732_v1  ;;  %v2672_v60 = vpop.f32.mrb[62].mxu1 }
 0x2ae   : > { %v1840_v41 = vadd.f32 %v2672_v60, %v1743_v33  ;;  %v1831_v19 = vpop.f32.mrb[63].mxu1 }
 0x2af   : > { %v1832_v12 = vadd.f32 %v1831_v19, %v3788_v10  ;;  %2684 = vmatpush3.bf16.msra.mxu0 %v1862_v8 }
 0x2b0   : > { %v1864_v14 = vpack.c.bf16 %v1840_v41, %v1837_v13  ;;  %2685 = vmatprep.subr.bf16.mxu0 %v4064_v52 }
 0x2b1   : > { %v1863_v39 = vpack.c.bf16 %v1832_v12, %v1829_v0 }
 0x2b3   : > { %2686 = vmatpush3.bf16.msra.mxu0 %v1863_v39 }
 0x2b4   : > { %2687 = vmatprep.subr.bf16.mxu0 %v4064_v52 }
 0x2b7   : > { %2688 = vmatpush3.bf16.msra.mxu0 %v1864_v14 }
 0x2ba   : > { %2690 = vmatmul.mubr.msk.bf16.vlgmr.msra.gmra.mrb[0].mxu0 %vm2368_vm4, %v2978_v43 }
 0x38c   : > { %1920 = sbr.rel (%p2370_p6) target bundleno = 917 (0x395), region = 80 }
 0x38d   : > { %v1899_v53 = vpop.f32.mrb[0].mxu0 }
 0x38e   : > { %v2784_v1 = vadd.f32 %v2310_v21, %v1899_v53  ;;  %v2691_v10 = vpop.f32.mrb[1].mxu0 }
 0x38f   : > { %v1902_v51 = vpop.f32.mrb[2].mxu0 }
 0x390   : > { %v1915_v48 = vmax.f32 %v2784_v1, 0.0  ;;  %v2785_v57 = vadd.f32 %v2310_v21, %v1902_v51  ;;  %v2692_v36 = vpop.f32.mrb[3].mxu0 }
 0x392   : > { %v1916_v45 = vmax.f32 %v2785_v57, 0.0  ;;  %1921 = vst [vmem:[#allocation2] sm:$0xff] (!%p2370_p6), %v1915_v48 }
 0x394   : > { %1922 = vst [vmem:[#allocation2 + $0x8] sm:$0xff] %v1916_v45 }
 0x395 PF: > { %p2371_p7 = scmp.ne.s32.totalorder %s2962_s17, 1 }
 0x396   : > { %v1976_v52 = vld [vmem:[%s4024_s7 + $0x80] sm:$0xff] (!%p2371_p7)  ;;  %v1977_v25 = vld [vmem:[%s4024_s7 + $0x88] sm:$0xff] (!%p2371_p7)  ;;  %v1927_v3 = vrot.slane (!%p2371_p7), %v1915_v48, 4  ;;  %v1933_v42 = vrot.slane (!%p2371_p7), %v1916_v45, 4  ;;  %v1978_v35 = vld [vmem:[%s4024_s7 + $0x90] sm:$0xff] (!%p2371_p7)  ;;  %v2979_v62 = vmov (!%p2371_p7), 0.0|0.0  }
 0x397   : > { %1926 = sbr.rel (%p2371_p7) target bundleno = 1707 (0x6ab), region = 84  ;;  %v1960_v29 = vld [vmem:[%s4024_s7] sm:$0xff] (!%p2371_p7)  ;;  %v2728_v16 = vpack.c.bf16 (!%p2371_p7), %v1977_v25, %v1976_v52  ;;  %v1961_v61 = vld [vmem:[%s4024_s7 + $0x8] sm:$0xff] (!%p2371_p7)  ;;  %v1979_v28 = vld [vmem:[%s4024_s7 + $0x98] sm:$0xff] (!%p2371_p7)  ;;  %2760 = vmatprep.subr.bf16.mxu1 (!%p2371_p7), %v2979_v62  ;;  %vm1953_vm5 = vcmask (!%p2371_p7), 1041409   ;;  %vm2980_vm6 = vmmov (!%p2371_p7), 0  }
 0x398   : > { %v2730_v33 = vpack.c.bf16 (!%p2371_p7), %v1961_v61, %v1960_v29  ;;  %v2732_v5 = vpack.c.bf16 (!%p2371_p7), %v1979_v28, %v1978_v35  ;;  %v1962_v22 = vld [vmem:[%s4024_s7 + $0x10] sm:$0xff] (!%p2371_p7)  ;;  %v1963_v31 = vld [vmem:[%s4024_s7 + $0x18] sm:$0xff] (!%p2371_p7)  ;;  %v1980_v2 = vld [vmem:[%s4024_s7 + $0xa0] sm:$0xff] (!%p2371_p7)  ;;  %v1940_v56 = vadd.f32 (!%p2371_p7), %v1927_v3, %v1915_v48  ;;  %v1946_v38 = vadd.f32 (!%p2371_p7), %v1933_v42, %v1916_v45 }
 0x399   : > { %2729 = vmatprep.subr.bf16.mxu0 (!%p2371_p7), %v2728_v16  ;;  %v1981_v6 = vld [vmem:[%s4024_s7 + $0xa8] sm:$0xff] (!%p2371_p7)  ;;  %v2734_v9 = vpack.c.bf16 (!%p2371_p7), %v1963_v31, %v1962_v22  ;;  %v1964_v34 = vld [vmem:[%s4024_s7 + $0x20] sm:$0xff] (!%p2371_p7)  ;;  %v1982_v54 = vld [vmem:[%s4024_s7 + $0xb0] sm:$0xff] (!%p2371_p7)  ;;  %v1928_v4 = vmax.f32 (!%p2371_p7), %v1915_v48, %v1927_v3  ;;  %v1934_v0 = vmax.f32 (!%p2371_p7), %v1916_v45, %v1933_v42  ;;  %vm2165_vm8 = vcmask (!%p2371_p7), 1041408  }
 0x39a   : > { %2731 = vmatpush3.bf16.msra.mxu0 (!%p2371_p7), %v2730_v33  ;;  %v1941_v49 = vrot.slane (!%p2371_p7), %v1940_v56, 2  ;;  %v1947_v17 = vrot.slane (!%p2371_p7), %v1946_v38, 2  ;;  %v2736_v46 = vpack.c.bf16 (!%p2371_p7), %v1981_v6, %v1980_v2  ;;  %v1965_v32 = vld [vmem:[%s4024_s7 + $0x28] sm:$0xff] (!%p2371_p7)  ;;  %v1983_v47 = vld [vmem:[%s4024_s7 + $0xb8] sm:$0xff] (!%p2371_p7)  ;;  %v1966_v40 = vld [vmem:[%s4024_s7 + $0x30] sm:$0xff] (!%p2371_p7) }
 0x39b   : > { %2733 = vmatprep.subr.bf16.mxu0 (!%p2371_p7), %v2732_v5  ;;  %v2738_v20 = vpack.c.bf16 (!%p2371_p7), %v1965_v32, %v1964_v34  ;;  %v2740_v23 = vpack.c.bf16 (!%p2371_p7), %v1983_v47, %v1982_v54  ;;  %v1967_v50 = vld [vmem:[%s4024_s7 + $0x38] sm:$0xff] (!%p2371_p7)  ;;  %v1984_v63 = vld [vmem:[%s4024_s7 + $0xc0] sm:$0xff] (!%p2371_p7)  ;;  %v1985_v24 = vld [vmem:[%s4024_s7 + $0xc8] sm:$0xff] (!%p2371_p7)  ;;  %v1929_v53 = vrot.slane (!%p2371_p7), %v1928_v4, 2  ;;  %v1935_v1 = vrot.slane (!%p2371_p7), %v1934_v0, 2 }
 0x39c   : > { %v1942_v11 = vadd.f32 (!%p2371_p7), %v1941_v49, %v1940_v56  ;;  %v1948_v30 = vadd.f32 (!%p2371_p7), %v1947_v17, %v1946_v38  ;;  %v2070_v8 = vld [vmem:[%s4026_s9] sm:$0xff] (!%p2371_p7)  ;;  %v2071_v55 = vld [vmem:[%s4026_s9 + $0x8] sm:$0xff] (!%p2371_p7)  ;;  %v2072_v13 = vld [vmem:[%s4026_s9 + $0x10] sm:$0xff] (!%p2371_p7)  ;;  %v2742_v58 = vpack.c.bf16 (!%p2371_p7), %v1967_v50, %v1966_v40  ;;  %v2744_v41 = vpack.c.bf16 (!%p2371_p7), %v1985_v24, %v1984_v63 }
 0x39d   : > { %v2073_v15 = vld [vmem:[%s4026_s9 + $0x18] sm:$0xff] (!%p2371_p7)  ;;  %v2761_v60 = vpack.c.bf16 (!%p2371_p7), %v2071_v55, %v2070_v8  ;;  %v1968_v19 = vld [vmem:[%s4024_s7 + $0x40] sm:$0xff] (!%p2371_p7)  ;;  %v1969_v12 = vld [vmem:[%s4024_s7 + $0x48] sm:$0xff] (!%p2371_p7)  ;;  %v1930_v3 = vmax.f32 (!%p2371_p7), %v1928_v4, %v1929_v53  ;;  %v1936_v42 = vmax.f32 (!%p2371_p7), %v1934_v0, %v1935_v1  ;;  %v2981_v63 = vmov (!%p2371_p7), 0.0  }
 0x39e   : > { %2735 = vmatpush3.bf16.msra.mxu0 %v2734_v9  ;;  %v1943_v44 = vrot.slane %v1942_v11, 1  ;;  %v1949_v27 = vrot.slane %v1948_v30, 1  ;;  %v1986_v14 = vld [vmem:[%s4024_s7 + $0xd0] sm:$0xff]  ;;  %v1987_v59 = vld [vmem:[%s4024_s7 + $0xd8] sm:$0xff]  ;;  %v2764_v39 = vpack.c.bf16 %v2073_v15, %v2072_v13  ;;  %v2074_v18 = vld [vmem:[%s4026_s9 + $0x20] sm:$0xff]  ;;  %v2746_v21 = vpack.c.bf16 %v1969_v12, %v1968_v19  ;;  %2725 = vmatprep.mubr.msk.f32.mxu1 %vm2980_vm6, %v2981_v63 }
 0x39f   : > { %2737 = vmatprep.subr.bf16.mxu0 %v2736_v46  ;;  %2762 = vmatpush3.bf16.msra.mxu1 %v2761_v60  ;;  %v2075_v43 = vld [vmem:[%s4026_s9 + $0x28] sm:$0xff]  ;;  %v2748_v10 = vpack.c.bf16 %v1987_v59, %v1986_v14  ;;  %v1970_v51 = vld [vmem:[%s4024_s7 + $0x50] sm:$0xff]  ;;  %v1971_v48 = vld [vmem:[%s4024_s7 + $0x58] sm:$0xff]  ;;  %v1931_v56 = vrot.slane %v1930_v3, 1  ;;  %v1937_v38 = vrot.slane %v1936_v42, 1 }
 0x3a0   : > { %v1944_v26 = vadd.f32 %v1943_v44, %v1942_v11  ;;  %v1950_v37 = vadd.f32 %v1949_v27, %v1948_v30  ;;  %2763 = vmatprep.subr.bf16.mxu1 %v2979_v62  ;;  %v1988_v57 = vld [vmem:[%s4024_s7 + $0xe0] sm:$0xff]  ;;  %v1989_v36 = vld [vmem:[%s4024_s7 + $0xe8] sm:$0xff]  ;;  %v2767_v45 = vpack.c.bf16 %v2075_v43, %v2074_v18  ;;  %v2076_v52 = vld [vmem:[%s4026_s9 + $0x30] sm:$0xff]  ;;  %v2750_v29 = vpack.c.bf16 %v1971_v48, %v1970_v51 }
 0x3a1   : > { %v2077_v25 = vld [vmem:[%s4026_s9 + $0x38] sm:$0xff]  ;;  %v2752_v16 = vpack.c.bf16 %v1989_v36, %v1988_v57  ;;  %v1972_v61 = vld [vmem:[%s4024_s7 + $0x60] sm:$0xff]  ;;  %v1973_v35 = vld [vmem:[%s4024_s7 + $0x68] sm:$0xff]  ;;  %v1932_v54 = vmax.f32 %v1930_v3, %v1931_v56  ;;  %v1938_v47 = vmax.f32 %v1936_v42, %v1937_v38 }
 0x3a2   : > { %2739 = vmatpush3.bf16.msra.mxu0 %v2738_v20  ;;  %v1958_v7 = vsel %vm1953_vm5, %v1950_v37, %v1944_v26  ;;  %v1990_v28 = vld [vmem:[%s4024_s7 + $0xf0] sm:$0xff]  ;;  %v1991_v33 = vld [vmem:[%s4024_s7 + $0xf8] sm:$0xff]  ;;  %v2770_v5 = vpack.c.bf16 %v2077_v25, %v2076_v52  ;;  %v2078_v22 = vld [vmem:[%s4026_s9 + $0x40] sm:$0xff]  ;;  %v2754_v2 = vpack.c.bf16 %v1973_v35, %v1972_v61 }
 0x3a3   : > { %2741 = vmatprep.subr.bf16.mxu0 %v2740_v23  ;;  %2063 = vmatprep.mubr.f32.mxu0 %v1958_v7  ;;  %v2079_v31 = vld [vmem:[%s4026_s9 + $0x48] sm:$0xff]  ;;  %v2756_v6 = vpack.c.bf16 %v1991_v33, %v1990_v28  ;;  %v1974_v9 = vld [vmem:[%s4024_s7 + $0x70] sm:$0xff]  ;;  %v1975_v49 = vld [vmem:[%s4024_s7 + $0x78] sm:$0xff]  ;;  %v1954_v30 = vsel %vm1953_vm5, %v1938_v47, %v1932_v54 }
 0x3a4   : > { %2765 = vmatpush3.bf16.msra.mxu1 %v2764_v39  ;;  %v2773_v17 = vpack.c.bf16 %v2079_v31, %v2078_v22  ;;  %v2080_v46 = vld [vmem:[%s4026_s9 + $0x50] sm:$0xff]  ;;  %v2081_v34 = vld [vmem:[%s4026_s9 + $0x58] sm:$0xff]  ;;  %v2758_v32 = vpack.c.bf16 %v1975_v49, %v1974_v9  ;;  %v2082_v20 = vld [vmem:[%s4026_s9 + $0x60] sm:$0xff] }
 0x3a5   : > { %2766 = vmatprep.subr.bf16.mxu1 %v2979_v62  ;;  %v2776_v11 = vpack.c.bf16 %v2081_v34, %v2080_v46  ;;  %v2083_v44 = vld [vmem:[%s4026_s9 + $0x68] sm:$0xff]  ;;  %v2084_v23 = vld [vmem:[%s4026_s9 + $0x70] sm:$0xff]  ;;  %v2085_v40 = vld [vmem:[%s4026_s9 + $0x78] sm:$0xff] }
 0x3a6   : > { %2743 = vmatpush3.bf16.msra.mxu0 %v2742_v58  ;;  %v2779_v27 = vpack.c.bf16 %v2083_v44, %v2082_v20  ;;  %v2782_v50 = vpack.c.bf16 %v2085_v40, %v2084_v23  ;;  %v2372_v26 = vld [vmem:[%s4025_s8] ss:$0 sm:$0xff]  ;;  %v4070_v15 = vld [vmem:[#allocation8_spill] sm:$0xff] }
 0x3a7   : > { %2745 = vmatprep.subr.bf16.mxu0 %v2744_v41  ;;  %v2373_v55 = vld [vmem:[%s4027_s10] ss:$0 sm:$0xff]  ;;  %vm2163_vm7 = vcmp.lt.s32.totalorder %v4070_v15, 3 }
 0x3a8   : > { %2768 = vmatpush3.bf16.msra.mxu1 %v2767_v45 }
 0x3a9   : > { %2769 = vmatprep.subr.bf16.mxu1 %v2979_v62 }
 0x3aa   : > { %2747 = vmatpush3.bf16.msra.mxu0 %v2746_v21 }
 0x3ab   : > { %2749 = vmatprep.subr.bf16.mxu0 %v2748_v10 }
 0x3ac   : > { %2771 = vmatpush3.bf16.msra.mxu1 %v2770_v5 }
 0x3ad   : > { %2772 = vmatprep.subr.bf16.mxu1 %v2979_v62 }
 0x3ae   : > { %2751 = vmatpush3.bf16.msra.mxu0 %v2750_v29 }
 0x3af   : > { %2753 = vmatprep.subr.bf16.mxu0 %v2752_v16 }
 0x3b0   : > { %2774 = vmatpush3.bf16.msra.mxu1 %v2773_v17 }
 0x3b1   : > { %2775 = vmatprep.subr.bf16.mxu1 %v2979_v62 }
 0x3b2   : > { %2755 = vmatpush3.bf16.msra.mxu0 %v2754_v2 }
 0x3b3   : > { %2757 = vmatprep.subr.bf16.mxu0 %v2756_v6 }
 0x3b4   : > { %2777 = vmatpush3.bf16.msra.mxu1 %v2776_v11 }
 0x3b5   : > { %2778 = vmatprep.subr.bf16.mxu1 %v2979_v62 }
 0x3b6   : > { %2759 = vmatpush3.bf16.msra.mxu0 %v2758_v32 }
 0x3b8   : > { %2780 = vmatpush3.bf16.msra.mxu1 %v2779_v27 }
 0x3b9   : > { %2064 = vmatmul.mubr.f32.vlgmr.msra.gmra.mrb[0].mxu0 %v1954_v30  ;;  %2781 = vmatprep.subr.bf16.mxu1 %v2979_v62 }
 0x3bc   : > { %2783 = vmatpush3.bf16.msra.mxu1 %v2782_v50 }
 0x48c   : > { %v2583_v24 = vpop.f32.mrb[0].mxu0 }
 0x48d   : > { %v2584_v37 = vpop.f32.mrb[1].mxu0 }
 0x48e   : > { %v2585_v62 = vadd.f32 %v2584_v37, %v2583_v24 }
 0x490   : > { %v2066_v8 = vadd.f32 %v2585_v62, %v2372_v26 }
 0x492   : > { %v2069_v4 = vmax.f32 %v2066_v8, 0.0 }
 0x494   : > { %2726 = vmatmul.mubr.f32.vlgmr.msra.gmra.mrb[0].mxu1 %v2069_v4 }
 0x567   : > { %v2159_v13 = vpop.f32.mrb[0].mxu1 }
 0x568   : > { %v2160_v58 = vadd.f32 %v2373_v55, %v2159_v13  ;;  %v2727_v7 = vpop.f32.mrb[1].mxu1 }
 0x56a   : > { %v2164_v0 = vsel %vm2163_vm7, %v2160_v58, -1e+30 }
 0x56b   : > { %v2166_v60 = vsel %vm2165_vm8, %v2164_v0, -inf }
 0x56c   : > { %2167 = vmax.xlane.f32.xlu0 %v2166_v60 }
 0x5f9   : > { %v2168_v41 = vpop.xlane.xlu0 %2167 }
 0x5fa   : > { %v2169_v19 = vsub.f32 %v2164_v0, %v2168_v41 }
 0x5fc   : > { %v2170_v12 = vmul.f32 1.442695, %v2169_v19 }
 0x5fe   : > { %2914 = vpow2.f32 %v2170_v12 }
 0x608   : > { %v2915_v14 = vpop.eup %2914 }
 0x609   : > { %v2172_v59 = vsel %vm2163_vm7, %v2915_v14, 0.0 }
 0x60a   : > { %v2173_v39 = vsel %vm2165_vm8, %v2172_v59, 0.0 }
 0x60b   : > { %2174 = vadd.xlane.f32.xlu0 %v2173_v39 }
 0x698   : > { %v2175_v18 = vpop.xlane.xlu0 %2174 }
 0x699   : > { %2916 = vlog2.f32 %v2175_v18 }
 0x6a3   : > { %v2917_v43 = vpop.eup %2916 }
 0x6a4   : > { %v2177_v21 = vmul.f32 0.6931472, %v2917_v43 }
 0x6a6   : > { %v2178_v53 = vadd.f32 %v2177_v21, %v2168_v41 }
 0x6a8   : > { %v2179_v1 = vsub.f32 %v2164_v0, %v2178_v53 }
 0x6aa   : > { %2180 = vst [vmem:[#allocation4] sm:$0x3] %v2179_v1 }
 0x6ab PF: > { %s4071_s20 = sadd.s32 4294967295, %s2970_s19   ;;  %s2982_s23 = smov [#allocation4]  }
 0x6ac   : > { %p3982_p8 = scmp.eq.s32.totalorder %s4071_s20, 1  ;;  %s2188_s22 = sshll.u32 %s2982_s23, 4  ;;  %s2189_s22 = int_to_ptr.vmem [resolvable:$true] %s2188_s22 }
 0x6ad   : > { %s2918_s30 = scalar_lea.vmem %s2189_s22, 32  ;;  %p2925_p12 = scmp.lt.s32.totalorder %s2189_s22, %s2189_s22 }
 0x6ae   : > { %p2919_p9 = scmp.ne.s32.totalorder %s2189_s22, %s2918_s30  ;;  %p2926_p13 = scmp.lt.s32.totalorder %s2918_s30, %s2918_s30 }
 0x6b0   : > { %p2920_p10 = pnand %p2919_p9, %p3982_p8  ;;  %p2927_p0 = por %p2926_p13, %p2925_p12 }
 0x6b2   : > { %p2921_p11 = pneg %p2920_p10 }
 0x6b4   : > { %p2928_p1 = pnand %p2927_p0, %p2921_p11 }
 0x6b6   : > { %2931 = shalt.err (!%p2928_p1)
}
 0x6b7   : > { %s2932_s13 = scalar_lea.hbm %s4028_s11, 32 }
 0x6b8   : > { %p2933_p2 = scmp.ne.s32.totalorder %s4028_s11, %s2932_s13  ;;  %p2938_p5 = scmp.lt.u32.totalorder %s2932_s13, %s4028_s11 }
 0x6ba   : > { %p2934_p3 = pnand %p2933_p2, %p3982_p8 }
 0x6bc   : > { %p2935_p4 = pneg %p2934_p3 }
 0x6be   : > { %p2940_p6 = pnand %p2938_p5, %p2935_p4 }
 0x6c0   : > { %2943 = shalt.err (!%p2940_p6)
}
 0x6c1   : > { %2792 = dma.vmem_to_hbm [thread:$0]  (%p3982_p8), %s2189_s22, 32, %s4028_s11, [#allocation5]  }
 0x6c2   : > { %2957 = dma.done.wait (%p3982_p8), [#allocation5], 32  }
 0x6c3   : > { %2959 = vsyncadd (%p3982_p8), [#allocation5], 4294967264 }
 0x6c4 PF: > { %s22_s19 = sadd.s32 1, %s2970_s19   ;;  %s4073_s28 = sld [smem:[#allocation7_spill]] }
 0x6c5   : > { %p19_p7 = scmp.ge.s32.totalorder %s22_s19, 4   ;;  %s4074_s17 = smov %s2966_s18 }
 0x6c7   :  { %21 = sbr.rel (!%p19_p7) target bundleno = 2 (0x2), region = 126 }
 0x6ca   : > { %s4075_s18 = smov %s4073_s28 }
 0x6ce   :  { %2201 = vsyncpa [#allocation5], 1 }
 0x6cf   :  { %2203 = vsyncpa [#allocation5 + $0x1], 1 }

</bundles_post_ra>
